<compile_context>
chip_gen: v5e
topology: v5e:2x2
jax: 0.10.0
libtpu: 0.0.40
codegen_flags: <defaults>
</compile_context>

<pallas_src>
import jax
import jax.numpy as jnp
from jax.experimental import pallas as pl
from jax.experimental.pallas import tpu as pltpu

# ----------------------------- config ---------------------------------------
INPUT_SIZE = 4
HIDDEN_SIZE = 32
LSTM_LAYERS = 2
OUTPUT_SIZE = 1
BATCH = 2
SEQ = 8


# ----------------------------- Pallas kernel --------------------------------
def mynet_kernel(x_ref, w0_ref, wrec_ref, wtail_ref, y_ref, state_ref):
    """Whole forward pass in one invocation (everything fits in VMEM).

    x_ref    : (T*B, I+1)  time-major flattened input with a trailing ones
               column (folds the layer-0 bias into the hoisted projection).
    w0_ref   : (I+1, 4H)   layer-0 input projection + bias row; gate columns
               permuted to (i, f, o, g) with the g block pre-scaled by 2.
    wrec_ref : (2H, 8H)    [[whh0, wih1], [0, whh1]] (same gate permutation/scale).
    wtail_ref: (H+2, 4H)   rows 0:H,0:O = wlin; row H = b1; row H+1,0:O = blin.
    y_ref    : (T, B, O)   per-timestep linear output.
    state_ref: (2L, B, H)  rows 0..L-1 = h_n, rows L..2L-1 = c_n.
    """
    TB = x_ref.shape[0]
    H = wrec_ref.shape[0] // 2
    T, B, O = y_ref.shape

    # ---- hoisted, off-critical-path reads / prologue ------------------------
    wlin = wtail_ref[:H, :O]                       # (H, O)  f32 head weight
    b1 = wtail_ref[H:H + 1, :]                     # (1, 4H) layer-1 bias
    blin = wtail_ref[H + 1:H + 2, :O]              # (1, O)
    b1b = jnp.broadcast_to(b1, (B, 4 * H))         # hoisted broadcast

    # Layer-0 input projection for ALL timesteps in one matmul (bias folded).
    gx0 = jnp.dot(x_ref[...], w0_ref[...],
                  preferred_element_type=jnp.float32)      # (T*B, 4H)

    # Recurrent weight slab as bf16 MXU operand (f32 accumulate downstream).
    wrec_bf = wrec_ref[...].astype(jnp.bfloat16)           # (2H, 8H)

    def gate_update(gates, c):
        # Gate columns are (i, f, o, g) with the g pre-activation scaled by 2,
        # so tanh(z) = 2*sigmoid(2z) - 1 folds into a single sigmoid pass.
        s = jax.nn.sigmoid(gates)                           # one EUP pass
        i = s[:, 0 * H:1 * H]
        f = s[:, 1 * H:2 * H]
        o = s[:, 2 * H:3 * H]
        g = 2.0 * s[:, 3 * H:4 * H] - 1.0
        c_new = f * c + i * g
        h_new = o * jnp.tanh(c_new)                         # one EUP pass
        return h_new, c_new

    # ---- wave 0: layer-0 step 0 only (zero initial state -> no matmul) ------
    zeros_bh = jnp.zeros((B, H), jnp.float32)
    h0, c0 = gate_update(gx0[0:B, :], zeros_bh)
    h1, c1 = zeros_bh, zeros_bh

    # ---- waves 1..T-1: layer-0 step w + layer-1 step w-1, fully unrolled ----
    for w in range(1, T):
        # One fused MXU call per wave: [h0 | h1] @ [[whh0, wih1], [0, whh1]].
        hh = jnp.concatenate([h0, h1], axis=1).astype(jnp.bfloat16)   # (B, 2H)
        mm = jnp.dot(hh, wrec_bf, preferred_element_type=jnp.float32)  # (B, 8H)
        gates0 = mm[:, :4 * H] + gx0[w * B:(w + 1) * B, :]   # layer-0 step w
        gates1 = mm[:, 4 * H:] + b1b                         # layer-1 step w-1
        h0_new, c0_new = gate_update(gates0, c0)
        h1_new, c1_new = gate_update(gates1, c1)
        # Linear head for layer-1 output at time (w-1); off the serial chain.
        y_ref[w - 1] = (jnp.dot(h1_new, wlin,
                                preferred_element_type=jnp.float32) + blin)
        h0, c0, h1, c1 = h0_new, c0_new, h1_new, c1_new

    # ---- wave T: layer-1 step T-1 only ---------------------------------------
    hh = jnp.concatenate([h0, h1], axis=1).astype(jnp.bfloat16)
    mm = jnp.dot(hh, wrec_bf, preferred_element_type=jnp.float32)
    gates1 = mm[:, 4 * H:] + b1b
    h1, c1 = gate_update(gates1, c1)
    y_ref[T - 1] = (jnp.dot(h1, wlin,
                            preferred_element_type=jnp.float32) + blin)

    # ---- final states: merged (2L, B, H) output ------------------------------
    state_ref[0] = h0
    state_ref[1] = h1
    state_ref[2] = c0
    state_ref[3] = c1


# ----------------------------- wrapper ---------------------------------------
def mynet_forward(x_btI, packed):
    """x_btI: (B, T, I) float32 (PyTorch batch_first). Returns (y, (h_n, c_n))."""
    B, T, I = x_btI.shape
    H, O = HIDDEN_SIZE, OUTPUT_SIZE

    # Layout plumbing stays in XLA: time-major flatten + ones column for bias.
    x_tb = jnp.transpose(x_btI, (1, 0, 2)).reshape(T * B, I)
    x_aug = jnp.concatenate([x_tb, jnp.ones((T * B, 1), jnp.float32)], axis=1)

    flops = (2 * T * B * (I + 1) * 4 * H          # hoisted layer-0 projection
             + 2 * T * B * (2 * H) * (8 * H)      # fused recurrent matmuls
             + 2 * T * B * H * O)                 # per-step linear head
    transcendentals = T * B * (2 * 4 * H + 2 * H)
    io_elems = (T * B * (I + 1) + (I + 1) * 4 * H + 2 * H * 8 * H
                + (H + 2) * 4 * H + T * B * O + 2 * LSTM_LAYERS * B * H)
    cost = pl.CostEstimate(flops=flops, transcendentals=transcendentals,
                           bytes_accessed=4 * io_elems)

    kernel = pl.pallas_call(
        mynet_kernel,
        out_shape=(
            jax.ShapeDtypeStruct((T, B, O), jnp.float32),
            jax.ShapeDtypeStruct((2 * LSTM_LAYERS, B, H), jnp.float32),
        ),
        in_specs=[pl.BlockSpec(memory_space=pltpu.MemorySpace.VMEM)] * 4,
        out_specs=(pl.BlockSpec(memory_space=pltpu.MemorySpace.VMEM),) * 2,
        cost_estimate=cost,
    )

    y_tbo, state = kernel(x_aug, packed["w0"], packed["wrec"], packed["wtail"])
    y_bto = jnp.transpose(y_tbo, (1, 0, 2))       # back to batch_first
    h_n = state[:LSTM_LAYERS]
    c_n = state[LSTM_LAYERS:]
    return y_bto, (h_n, c_n)


# ----------------------------- parameters ------------------------------------
def init_params(key):
    """Logical PyTorch-layout parameters (gate order i, f, g, o)."""
    H, I, O = HIDDEN_SIZE, INPUT_SIZE, OUTPUT_SIZE
    k = 1.0 / jnp.sqrt(H)
    keys = jax.random.split(key, 12)

    def u(rk, shape):
        return jax.random.uniform(rk, shape, jnp.float32, -k, k)

    return {
        "wih0": u(keys[0], (4 * H, I)), "whh0": u(keys[1], (4 * H, H)),
        "bih0": u(keys[2], (4 * H,)), "bhh0": u(keys[3], (4 * H,)),
        "wih1": u(keys[4], (4 * H, H)), "whh1": u(keys[5], (4 * H, H)),
        "bih1": u(keys[6], (4 * H,)), "bhh1": u(keys[7], (4 * H,)),
        "wlin": u(keys[8], (O, H)), "blin": u(keys[9], (O,)),
    }


def _permute_scale(a):
    """Last axis 4H, torch order (i,f,g,o) -> kernel order (i,f,o,g) with the
    g-gate block pre-scaled by 2 (folds tanh into sigmoid in-kernel)."""
    H = HIDDEN_SIZE
    i = a[..., 0:H]
    f = a[..., H:2 * H]
    g = a[..., 2 * H:3 * H]
    o = a[..., 3 * H:4 * H]
    return jnp.concatenate([i, f, o, 2.0 * g], axis=-1)


def pack_params(p):
    """Host-side packing of the 10 logical tensors into 3 kernel slabs."""
    H, O = HIDDEN_SIZE, OUTPUT_SIZE

    # Slab 1: layer-0 input projection with bias folded as an extra row.
    wih0_t = _permute_scale(p["wih0"].T)                              # (I, 4H)
    b0 = _permute_scale((p["bih0"] + p["bhh0"])[None, :])             # (1, 4H)
    w0 = jnp.concatenate([wih0_t, b0], axis=0)                        # (I+1, 4H)

    # Slab 2: fused recurrent weights [[whh0, wih1], [0, whh1]].
    whh0_t = _permute_scale(p["whh0"].T)                              # (H, 4H)
    wih1_t = _permute_scale(p["wih1"].T)                              # (H, 4H)
    whh1_t = _permute_scale(p["whh1"].T)                              # (H, 4H)
    top = jnp.concatenate([whh0_t, wih1_t], axis=1)                   # (H, 8H)
    bot = jnp.concatenate([jnp.zeros((H, 4 * H), jnp.float32), whh1_t], axis=1)
    wrec = jnp.concatenate([top, bot], axis=0)                        # (2H, 8H)

    # Slab 3: layer-1 bias + linear head.
    b1 = _permute_scale((p["bih1"] + p["bhh1"])[None, :])             # (1, 4H)
    wtail = jnp.zeros((H + 2, 4 * H), jnp.float32)
    wtail = wtail.at[:H, :O].set(p["wlin"].T)
    wtail = wtail.at[H, :].set(b1[0])
    wtail = wtail.at[H + 1, :O].set(p["blin"])

    return {"w0": w0, "wrec": wrec, "wtail": wtail}


# ----------------------------- pure-JAX reference ----------------------------
def mynet_ref(x_btI, p):
    """Standard PyTorch LSTM math (gate order i, f, g, o) on the logical params."""
    B, T, _ = x_btI.shape
    H = HIDDEN_SIZE

    def layer(seq, wih, whh, bih, bhh):                     # seq: (B, T, D)
        h = jnp.zeros((B, H), jnp.float32)
        c = jnp.zeros((B, H), jnp.float32)
        outs = []
        for t in range(T):
            gates = seq[:, t, :] @ wih.T + h @ whh.T + bih + bhh
            i = jax.nn.sigmoid(gates[:, 0 * H:1 * H])
            f = jax.nn.sigmoid(gates[:, 1 * H:2 * H])
            g = jnp.tanh(gates[:, 2 * H:3 * H])
            o = jax.nn.sigmoid(gates[:, 3 * H:4 * H])
            c = f * c + i * g
            h = o * jnp.tanh(c)
            outs.append(h)
        return jnp.stack(outs, axis=1), h, c

    s0, h0, c0 = layer(x_btI, p["wih0"], p["whh0"], p["bih0"], p["bhh0"])
    s1, h1, c1 = layer(s0, p["wih1"], p["whh1"], p["bih1"], p["bhh1"])
    y = s1 @ p["wlin"].T + p["blin"]
    return y, (jnp.stack([h0, h1], 0), jnp.stack([c0, c1], 0))


# ----------------------------- main -------------------------------------------
if __name__ == "__main__":
    key = jax.random.PRNGKey(0)
    k_x, k_p = jax.random.split(key)
    x = jax.random.normal(k_x, (BATCH, SEQ, INPUT_SIZE), jnp.float32)
    params = init_params(k_p)
    packed = pack_params(params)

    y, (h_n, c_n) = mynet_forward(x, packed)
    jax.block_until_ready((y, h_n, c_n))

    y_ref, (h_ref, c_ref) = mynet_ref(x, params)
    assert y.shape == (BATCH, SEQ, OUTPUT_SIZE)
    assert h_n.shape == (LSTM_LAYERS, BATCH, HIDDEN_SIZE)
    assert c_n.shape == (LSTM_LAYERS, BATCH, HIDDEN_SIZE)
    # Tolerance loosened vs f32 reference because the recurrent matmul uses
    # bf16 MXU operands (f32 accumulation) per the perf review.
    TOL = 5e-2
    assert jnp.allclose(y, y_ref, atol=TOL, rtol=TOL)
    assert jnp.allclose(h_n, h_ref, atol=TOL, rtol=TOL)
    assert jnp.allclose(c_n, c_ref, atol=TOL, rtol=TOL)

    print("KERNEL_OK")
</pallas_src>

<mosaic_0001>
module attributes {stable_mosaic.version = 11 : i64} {
  func.func @mynet_kernel(%arg0: memref<16x5xf32, #tpu.memory_space<vmem>>, %arg1: memref<5x128xf32, #tpu.memory_space<vmem>>, %arg2: memref<64x256xf32, #tpu.memory_space<vmem>>, %arg3: memref<34x128xf32, #tpu.memory_space<vmem>>, %arg4: memref<8x2x1xf32, #tpu.memory_space<vmem>>, %arg5: memref<4x2x32xf32, #tpu.memory_space<vmem>>) attributes {dimension_semantics = [], scalar_prefetch = 0 : i64, scratch_operands = 0 : i64, tpu.core_type = #tpu.core_type<tc>} {
    %c0 = arith.constant 0 : index
    %c0_0 = arith.constant 0 : index
    %0 = vector.load %arg3[%c0, %c0_0] : memref<34x128xf32, #tpu.memory_space<vmem>>, vector<32x1xf32>
    %c32 = arith.constant 32 : index
    %c0_1 = arith.constant 0 : index
    %1 = vector.load %arg3[%c32, %c0_1] : memref<34x128xf32, #tpu.memory_space<vmem>>, vector<1x128xf32>
    %c33 = arith.constant 33 : index
    %c0_2 = arith.constant 0 : index
    %2 = vector.load %arg3[%c33, %c0_2] : memref<34x128xf32, #tpu.memory_space<vmem>>, vector<1x1xf32>
    %3 = vector.shape_cast %1 : vector<1x128xf32> to vector<1x128xf32>
    %4 = vector.broadcast %3 : vector<1x128xf32> to vector<2x128xf32>
    %c0_3 = arith.constant 0 : index
    %c0_4 = arith.constant 0 : index
    %5 = vector.load %arg0[%c0_3, %c0_4] : memref<16x5xf32, #tpu.memory_space<vmem>>, vector<16x5xf32>
    %c0_5 = arith.constant 0 : index
    %c0_6 = arith.constant 0 : index
    %6 = vector.load %arg1[%c0_5, %c0_6] : memref<5x128xf32, #tpu.memory_space<vmem>>, vector<5x128xf32>
    %cst = arith.constant dense<0.000000e+00> : vector<16x128xf32>
    %7 = tpu.matmul %5, %6, %cst {dimension_numbers = #tpu.dot_dimension_numbers<[1], [0], [0], [1], [0, 0, 1, 1], [], []>} : vector<16x5xf32>, vector<5x128xf32>, vector<16x128xf32> -> vector<16x128xf32>
    %c0_7 = arith.constant 0 : index
    %c0_8 = arith.constant 0 : index
    %8 = vector.load %arg2[%c0_7, %c0_8] : memref<64x256xf32, #tpu.memory_space<vmem>>, vector<64x256xf32>
    %9 = arith.truncf %8 : vector<64x256xf32> to vector<64x256xbf16>
    %cst_9 = arith.constant 0.000000e+00 : f32
    %10 = vector.broadcast %cst_9 : f32 to vector<2x32xf32>
    %11 = vector.extract_strided_slice %7 {offsets = [0, 0], sizes = [2, 128], strides = [1, 1]} : vector<16x128xf32> to vector<2x128xf32>
    %12 = arith.negf %11 : vector<2x128xf32>
    %13 = math.exp %12 : vector<2x128xf32>
    %cst_10 = arith.constant 1.000000e+00 : f32
    %14 = vector.broadcast %cst_10 : f32 to vector<2x128xf32>
    %15 = arith.addf %14, %13 : vector<2x128xf32>
    %16 = arith.divf %14, %15 : vector<2x128xf32>
    %17 = vector.extract_strided_slice %16 {offsets = [0, 0], sizes = [2, 32], strides = [1, 1]} : vector<2x128xf32> to vector<2x32xf32>
    %18 = vector.extract_strided_slice %16 {offsets = [0, 32], sizes = [2, 32], strides = [1, 1]} : vector<2x128xf32> to vector<2x32xf32>
    %19 = vector.extract_strided_slice %16 {offsets = [0, 64], sizes = [2, 32], strides = [1, 1]} : vector<2x128xf32> to vector<2x32xf32>
    %20 = vector.extract_strided_slice %16 {offsets = [0, 96], sizes = [2, 32], strides = [1, 1]} : vector<2x128xf32> to vector<2x32xf32>
    %cst_11 = arith.constant 2.000000e+00 : f32
    %21 = vector.broadcast %cst_11 : f32 to vector<2x32xf32>
    %22 = arith.mulf %21, %20 : vector<2x32xf32>
    %cst_12 = arith.constant 1.000000e+00 : f32
    %23 = vector.broadcast %cst_12 : f32 to vector<2x32xf32>
    %24 = arith.subf %22, %23 : vector<2x32xf32>
    %25 = arith.mulf %18, %10 : vector<2x32xf32>
    %26 = arith.mulf %17, %24 : vector<2x32xf32>
    %27 = arith.addf %25, %26 : vector<2x32xf32>
    %28 = math.tanh %27 : vector<2x32xf32>
    %29 = arith.mulf %19, %28 : vector<2x32xf32>
    %30 = tpu.concatenate %29, %10 in 1 : vector<2x32xf32>, vector<2x32xf32> -> vector<2x64xf32>
    %31 = arith.truncf %30 : vector<2x64xf32> to vector<2x64xbf16>
    %cst_13 = arith.constant dense<0.000000e+00> : vector<2x256xf32>
    %32 = tpu.matmul %31, %9, %cst_13 {dimension_numbers = #tpu.dot_dimension_numbers<[1], [0], [0], [1], [0, 0, 1, 1], [], []>} : vector<2x64xbf16>, vector<64x256xbf16>, vector<2x256xf32> -> vector<2x256xf32>
    %33 = vector.extract_strided_slice %32 {offsets = [0, 0], sizes = [2, 128], strides = [1, 1]} : vector<2x256xf32> to vector<2x128xf32>
    %34 = vector.extract_strided_slice %7 {offsets = [2, 0], sizes = [2, 128], strides = [1, 1]} : vector<16x128xf32> to vector<2x128xf32>
    %35 = arith.addf %33, %34 : vector<2x128xf32>
    %36 = vector.extract_strided_slice %32 {offsets = [0, 128], sizes = [2, 128], strides = [1, 1]} : vector<2x256xf32> to vector<2x128xf32>
    %37 = arith.addf %36, %4 : vector<2x128xf32>
    %38 = arith.negf %35 : vector<2x128xf32>
    %39 = math.exp %38 : vector<2x128xf32>
    %cst_14 = arith.constant 1.000000e+00 : f32
    %40 = vector.broadcast %cst_14 : f32 to vector<2x128xf32>
    %41 = arith.addf %40, %39 : vector<2x128xf32>
    %42 = arith.divf %40, %41 : vector<2x128xf32>
    %43 = vector.extract_strided_slice %42 {offsets = [0, 0], sizes = [2, 32], strides = [1, 1]} : vector<2x128xf32> to vector<2x32xf32>
    %44 = vector.extract_strided_slice %42 {offsets = [0, 32], sizes = [2, 32], strides = [1, 1]} : vector<2x128xf32> to vector<2x32xf32>
    %45 = vector.extract_strided_slice %42 {offsets = [0, 64], sizes = [2, 32], strides = [1, 1]} : vector<2x128xf32> to vector<2x32xf32>
    %46 = vector.extract_strided_slice %42 {offsets = [0, 96], sizes = [2, 32], strides = [1, 1]} : vector<2x128xf32> to vector<2x32xf32>
    %cst_15 = arith.constant 2.000000e+00 : f32
    %47 = vector.broadcast %cst_15 : f32 to vector<2x32xf32>
    %48 = arith.mulf %47, %46 : vector<2x32xf32>
    %cst_16 = arith.constant 1.000000e+00 : f32
    %49 = vector.broadcast %cst_16 : f32 to vector<2x32xf32>
    %50 = arith.subf %48, %49 : vector<2x32xf32>
    %51 = arith.mulf %44, %27 : vector<2x32xf32>
    %52 = arith.mulf %43, %50 : vector<2x32xf32>
    %53 = arith.addf %51, %52 : vector<2x32xf32>
    %54 = math.tanh %53 : vector<2x32xf32>
    %55 = arith.mulf %45, %54 : vector<2x32xf32>
    %56 = arith.negf %37 : vector<2x128xf32>
    %57 = math.exp %56 : vector<2x128xf32>
    %cst_17 = arith.constant 1.000000e+00 : f32
    %58 = vector.broadcast %cst_17 : f32 to vector<2x128xf32>
    %59 = arith.addf %58, %57 : vector<2x128xf32>
    %60 = arith.divf %58, %59 : vector<2x128xf32>
    %61 = vector.extract_strided_slice %60 {offsets = [0, 0], sizes = [2, 32], strides = [1, 1]} : vector<2x128xf32> to vector<2x32xf32>
    %62 = vector.extract_strided_slice %60 {offsets = [0, 32], sizes = [2, 32], strides = [1, 1]} : vector<2x128xf32> to vector<2x32xf32>
    %63 = vector.extract_strided_slice %60 {offsets = [0, 64], sizes = [2, 32], strides = [1, 1]} : vector<2x128xf32> to vector<2x32xf32>
    %64 = vector.extract_strided_slice %60 {offsets = [0, 96], sizes = [2, 32], strides = [1, 1]} : vector<2x128xf32> to vector<2x32xf32>
    %cst_18 = arith.constant 2.000000e+00 : f32
    %65 = vector.broadcast %cst_18 : f32 to vector<2x32xf32>
    %66 = arith.mulf %65, %64 : vector<2x32xf32>
    %cst_19 = arith.constant 1.000000e+00 : f32
    %67 = vector.broadcast %cst_19 : f32 to vector<2x32xf32>
    %68 = arith.subf %66, %67 : vector<2x32xf32>
    %69 = arith.mulf %62, %10 : vector<2x32xf32>
    %70 = arith.mulf %61, %68 : vector<2x32xf32>
    %71 = arith.addf %69, %70 : vector<2x32xf32>
    %72 = math.tanh %71 : vector<2x32xf32>
    %73 = arith.mulf %63, %72 : vector<2x32xf32>
    %cst_20 = arith.constant dense<0.000000e+00> : vector<2x1xf32>
    %74 = tpu.matmul %73, %0, %cst_20 {dimension_numbers = #tpu.dot_dimension_numbers<[1], [0], [0], [1], [0, 0, 1, 1], [], []>} : vector<2x32xf32>, vector<32x1xf32>, vector<2x1xf32> -> vector<2x1xf32>
    %75 = vector.broadcast %2 : vector<1x1xf32> to vector<2x1xf32>
    %76 = arith.addf %74, %75 : vector<2x1xf32>
    %c0_21 = arith.constant 0 : index
    %c0_22 = arith.constant 0 : index
    %c0_23 = arith.constant 0 : index
    %77 = vector.load %arg4[%c0_21, %c0_22, %c0_23] : memref<8x2x1xf32, #tpu.memory_space<vmem>>, vector<1x2x1xf32>
    %78 = vector.shape_cast %77 : vector<1x2x1xf32> to vector<2x1xf32>
    %79 = vector.shape_cast %76 : vector<2x1xf32> to vector<1x2x1xf32>
    tpu.vector_store %arg4[%c0_21, %c0_22, %c0_23], %79 {strides = array<i32>} : memref<8x2x1xf32, #tpu.memory_space<vmem>>, vector<1x2x1xf32>,
    %80 = tpu.concatenate %55, %73 in 1 : vector<2x32xf32>, vector<2x32xf32> -> vector<2x64xf32>
    %81 = arith.truncf %80 : vector<2x64xf32> to vector<2x64xbf16>
    %cst_24 = arith.constant dense<0.000000e+00> : vector<2x256xf32>
    %82 = tpu.matmul %81, %9, %cst_24 {dimension_numbers = #tpu.dot_dimension_numbers<[1], [0], [0], [1], [0, 0, 1, 1], [], []>} : vector<2x64xbf16>, vector<64x256xbf16>, vector<2x256xf32> -> vector<2x256xf32>
    %83 = vector.extract_strided_slice %82 {offsets = [0, 0], sizes = [2, 128], strides = [1, 1]} : vector<2x256xf32> to vector<2x128xf32>
    %84 = vector.extract_strided_slice %7 {offsets = [4, 0], sizes = [2, 128], strides = [1, 1]} : vector<16x128xf32> to vector<2x128xf32>
    %85 = arith.addf %83, %84 : vector<2x128xf32>
    %86 = vector.extract_strided_slice %82 {offsets = [0, 128], sizes = [2, 128], strides = [1, 1]} : vector<2x256xf32> to vector<2x128xf32>
    %87 = arith.addf %86, %4 : vector<2x128xf32>
    %88 = arith.negf %85 : vector<2x128xf32>
    %89 = math.exp %88 : vector<2x128xf32>
    %cst_25 = arith.constant 1.000000e+00 : f32
    %90 = vector.broadcast %cst_25 : f32 to vector<2x128xf32>
    %91 = arith.addf %90, %89 : vector<2x128xf32>
    %92 = arith.divf %90, %91 : vector<2x128xf32>
    %93 = vector.extract_strided_slice %92 {offsets = [0, 0], sizes = [2, 32], strides = [1, 1]} : vector<2x128xf32> to vector<2x32xf32>
    %94 = vector.extract_strided_slice %92 {offsets = [0, 32], sizes = [2, 32], strides = [1, 1]} : vector<2x128xf32> to vector<2x32xf32>
    %95 = vector.extract_strided_slice %92 {offsets = [0, 64], sizes = [2, 32], strides = [1, 1]} : vector<2x128xf32> to vector<2x32xf32>
    %96 = vector.extract_strided_slice %92 {offsets = [0, 96], sizes = [2, 32], strides = [1, 1]} : vector<2x128xf32> to vector<2x32xf32>
    %cst_26 = arith.constant 2.000000e+00 : f32
    %97 = vector.broadcast %cst_26 : f32 to vector<2x32xf32>
    %98 = arith.mulf %97, %96 : vector<2x32xf32>
    %cst_27 = arith.constant 1.000000e+00 : f32
    %99 = vector.broadcast %cst_27 : f32 to vector<2x32xf32>
    %100 = arith.subf %98, %99 : vector<2x32xf32>
    %101 = arith.mulf %94, %53 : vector<2x32xf32>
    %102 = arith.mulf %93, %100 : vector<2x32xf32>
    %103 = arith.addf %101, %102 : vector<2x32xf32>
    %104 = math.tanh %103 : vector<2x32xf32>
    %105 = arith.mulf %95, %104 : vector<2x32xf32>
    %106 = arith.negf %87 : vector<2x128xf32>
    %107 = math.exp %106 : vector<2x128xf32>
    %cst_28 = arith.constant 1.000000e+00 : f32
    %108 = vector.broadcast %cst_28 : f32 to vector<2x128xf32>
    %109 = arith.addf %108, %107 : vector<2x128xf32>
    %110 = arith.divf %108, %109 : vector<2x128xf32>
    %111 = vector.extract_strided_slice %110 {offsets = [0, 0], sizes = [2, 32], strides = [1, 1]} : vector<2x128xf32> to vector<2x32xf32>
    %112 = vector.extract_strided_slice %110 {offsets = [0, 32], sizes = [2, 32], strides = [1, 1]} : vector<2x128xf32> to vector<2x32xf32>
    %113 = vector.extract_strided_slice %110 {offsets = [0, 64], sizes = [2, 32], strides = [1, 1]} : vector<2x128xf32> to vector<2x32xf32>
    %114 = vector.extract_strided_slice %110 {offsets = [0, 96], sizes = [2, 32], strides = [1, 1]} : vector<2x128xf32> to vector<2x32xf32>
    %cst_29 = arith.constant 2.000000e+00 : f32
    %115 = vector.broadcast %cst_29 : f32 to vector<2x32xf32>
    %116 = arith.mulf %115, %114 : vector<2x32xf32>
    %cst_30 = arith.constant 1.000000e+00 : f32
    %117 = vector.broadcast %cst_30 : f32 to vector<2x32xf32>
    %118 = arith.subf %116, %117 : vector<2x32xf32>
    %119 = arith.mulf %112, %71 : vector<2x32xf32>
    %120 = arith.mulf %111, %118 : vector<2x32xf32>
    %121 = arith.addf %119, %120 : vector<2x32xf32>
    %122 = math.tanh %121 : vector<2x32xf32>
    %123 = arith.mulf %113, %122 : vector<2x32xf32>
    %cst_31 = arith.constant dense<0.000000e+00> : vector<2x1xf32>
    %124 = tpu.matmul %123, %0, %cst_31 {dimension_numbers = #tpu.dot_dimension_numbers<[1], [0], [0], [1], [0, 0, 1, 1], [], []>} : vector<2x32xf32>, vector<32x1xf32>, vector<2x1xf32> -> vector<2x1xf32>
    %125 = vector.broadcast %2 : vector<1x1xf32> to vector<2x1xf32>
    %126 = arith.addf %124, %125 : vector<2x1xf32>
    %c1 = arith.constant 1 : index
    %c0_32 = arith.constant 0 : index
    %c0_33 = arith.constant 0 : index
    %127 = vector.load %arg4[%c1, %c0_32, %c0_33] : memref<8x2x1xf32, #tpu.memory_space<vmem>>, vector<1x2x1xf32>
    %128 = vector.shape_cast %127 : vector<1x2x1xf32> to vector<2x1xf32>
    %129 = vector.shape_cast %126 : vector<2x1xf32> to vector<1x2x1xf32>
    tpu.vector_store %arg4[%c1, %c0_32, %c0_33], %129 {strides = array<i32>} : memref<8x2x1xf32, #tpu.memory_space<vmem>>, vector<1x2x1xf32>,
    %130 = tpu.concatenate %105, %123 in 1 : vector<2x32xf32>, vector<2x32xf32> -> vector<2x64xf32>
    %131 = arith.truncf %130 : vector<2x64xf32> to vector<2x64xbf16>
    %cst_34 = arith.constant dense<0.000000e+00> : vector<2x256xf32>
    %132 = tpu.matmul %131, %9, %cst_34 {dimension_numbers = #tpu.dot_dimension_numbers<[1], [0], [0], [1], [0, 0, 1, 1], [], []>} : vector<2x64xbf16>, vector<64x256xbf16>, vector<2x256xf32> -> vector<2x256xf32>
    %133 = vector.extract_strided_slice %132 {offsets = [0, 0], sizes = [2, 128], strides = [1, 1]} : vector<2x256xf32> to vector<2x128xf32>
    %134 = vector.extract_strided_slice %7 {offsets = [6, 0], sizes = [2, 128], strides = [1, 1]} : vector<16x128xf32> to vector<2x128xf32>
    %135 = arith.addf %133, %134 : vector<2x128xf32>
    %136 = vector.extract_strided_slice %132 {offsets = [0, 128], sizes = [2, 128], strides = [1, 1]} : vector<2x256xf32> to vector<2x128xf32>
    %137 = arith.addf %136, %4 : vector<2x128xf32>
    %138 = arith.negf %135 : vector<2x128xf32>
    %139 = math.exp %138 : vector<2x128xf32>
    %cst_35 = arith.constant 1.000000e+00 : f32
    %140 = vector.broadcast %cst_35 : f32 to vector<2x128xf32>
    %141 = arith.addf %140, %139 : vector<2x128xf32>
    %142 = arith.divf %140, %141 : vector<2x128xf32>
    %143 = vector.extract_strided_slice %142 {offsets = [0, 0], sizes = [2, 32], strides = [1, 1]} : vector<2x128xf32> to vector<2x32xf32>
    %144 = vector.extract_strided_slice %142 {offsets = [0, 32], sizes = [2, 32], strides = [1, 1]} : vector<2x128xf32> to vector<2x32xf32>
    %145 = vector.extract_strided_slice %142 {offsets = [0, 64], sizes = [2, 32], strides = [1, 1]} : vector<2x128xf32> to vector<2x32xf32>
    %146 = vector.extract_strided_slice %142 {offsets = [0, 96], sizes = [2, 32], strides = [1, 1]} : vector<2x128xf32> to vector<2x32xf32>
    %cst_36 = arith.constant 2.000000e+00 : f32
    %147 = vector.broadcast %cst_36 : f32 to vector<2x32xf32>
    %148 = arith.mulf %147, %146 : vector<2x32xf32>
    %cst_37 = arith.constant 1.000000e+00 : f32
    %149 = vector.broadcast %cst_37 : f32 to vector<2x32xf32>
    %150 = arith.subf %148, %149 : vector<2x32xf32>
    %151 = arith.mulf %144, %103 : vector<2x32xf32>
    %152 = arith.mulf %143, %150 : vector<2x32xf32>
    %153 = arith.addf %151, %152 : vector<2x32xf32>
    %154 = math.tanh %153 : vector<2x32xf32>
    %155 = arith.mulf %145, %154 : vector<2x32xf32>
    %156 = arith.negf %137 : vector<2x128xf32>
    %157 = math.exp %156 : vector<2x128xf32>
    %cst_38 = arith.constant 1.000000e+00 : f32
    %158 = vector.broadcast %cst_38 : f32 to vector<2x128xf32>
    %159 = arith.addf %158, %157 : vector<2x128xf32>
    %160 = arith.divf %158, %159 : vector<2x128xf32>
    %161 = vector.extract_strided_slice %160 {offsets = [0, 0], sizes = [2, 32], strides = [1, 1]} : vector<2x128xf32> to vector<2x32xf32>
    %162 = vector.extract_strided_slice %160 {offsets = [0, 32], sizes = [2, 32], strides = [1, 1]} : vector<2x128xf32> to vector<2x32xf32>
    %163 = vector.extract_strided_slice %160 {offsets = [0, 64], sizes = [2, 32], strides = [1, 1]} : vector<2x128xf32> to vector<2x32xf32>
    %164 = vector.extract_strided_slice %160 {offsets = [0, 96], sizes = [2, 32], strides = [1, 1]} : vector<2x128xf32> to vector<2x32xf32>
    %cst_39 = arith.constant 2.000000e+00 : f32
    %165 = vector.broadcast %cst_39 : f32 to vector<2x32xf32>
    %166 = arith.mulf %165, %164 : vector<2x32xf32>
    %cst_40 = arith.constant 1.000000e+00 : f32
    %167 = vector.broadcast %cst_40 : f32 to vector<2x32xf32>
    %168 = arith.subf %166, %167 : vector<2x32xf32>
    %169 = arith.mulf %162, %121 : vector<2x32xf32>
    %170 = arith.mulf %161, %168 : vector<2x32xf32>
    %171 = arith.addf %169, %170 : vector<2x32xf32>
    %172 = math.tanh %171 : vector<2x32xf32>
    %173 = arith.mulf %163, %172 : vector<2x32xf32>
    %cst_41 = arith.constant dense<0.000000e+00> : vector<2x1xf32>
    %174 = tpu.matmul %173, %0, %cst_41 {dimension_numbers = #tpu.dot_dimension_numbers<[1], [0], [0], [1], [0, 0, 1, 1], [], []>} : vector<2x32xf32>, vector<32x1xf32>, vector<2x1xf32> -> vector<2x1xf32>
    %175 = vector.broadcast %2 : vector<1x1xf32> to vector<2x1xf32>
    %176 = arith.addf %174, %175 : vector<2x1xf32>
    %c2 = arith.constant 2 : index
    %c0_42 = arith.constant 0 : index
    %c0_43 = arith.constant 0 : index
    %177 = vector.load %arg4[%c2, %c0_42, %c0_43] : memref<8x2x1xf32, #tpu.memory_space<vmem>>, vector<1x2x1xf32>
    %178 = vector.shape_cast %177 : vector<1x2x1xf32> to vector<2x1xf32>
    %179 = vector.shape_cast %176 : vector<2x1xf32> to vector<1x2x1xf32>
    tpu.vector_store %arg4[%c2, %c0_42, %c0_43], %179 {strides = array<i32>} : memref<8x2x1xf32, #tpu.memory_space<vmem>>, vector<1x2x1xf32>,
    %180 = tpu.concatenate %155, %173 in 1 : vector<2x32xf32>, vector<2x32xf32> -> vector<2x64xf32>
    %181 = arith.truncf %180 : vector<2x64xf32> to vector<2x64xbf16>
    %cst_44 = arith.constant dense<0.000000e+00> : vector<2x256xf32>
    %182 = tpu.matmul %181, %9, %cst_44 {dimension_numbers = #tpu.dot_dimension_numbers<[1], [0], [0], [1], [0, 0, 1, 1], [], []>} : vector<2x64xbf16>, vector<64x256xbf16>, vector<2x256xf32> -> vector<2x256xf32>
    %183 = vector.extract_strided_slice %182 {offsets = [0, 0], sizes = [2, 128], strides = [1, 1]} : vector<2x256xf32> to vector<2x128xf32>
    %184 = vector.extract_strided_slice %7 {offsets = [8, 0], sizes = [2, 128], strides = [1, 1]} : vector<16x128xf32> to vector<2x128xf32>
    %185 = arith.addf %183, %184 : vector<2x128xf32>
    %186 = vector.extract_strided_slice %182 {offsets = [0, 128], sizes = [2, 128], strides = [1, 1]} : vector<2x256xf32> to vector<2x128xf32>
    %187 = arith.addf %186, %4 : vector<2x128xf32>
    %188 = arith.negf %185 : vector<2x128xf32>
    %189 = math.exp %188 : vector<2x128xf32>
    %cst_45 = arith.constant 1.000000e+00 : f32
    %190 = vector.broadcast %cst_45 : f32 to vector<2x128xf32>
    %191 = arith.addf %190, %189 : vector<2x128xf32>
    %192 = arith.divf %190, %191 : vector<2x128xf32>
    %193 = vector.extract_strided_slice %192 {offsets = [0, 0], sizes = [2, 32], strides = [1, 1]} : vector<2x128xf32> to vector<2x32xf32>
    %194 = vector.extract_strided_slice %192 {offsets = [0, 32], sizes = [2, 32], strides = [1, 1]} : vector<2x128xf32> to vector<2x32xf32>
    %195 = vector.extract_strided_slice %192 {offsets = [0, 64], sizes = [2, 32], strides = [1, 1]} : vector<2x128xf32> to vector<2x32xf32>
    %196 = vector.extract_strided_slice %192 {offsets = [0, 96], sizes = [2, 32], strides = [1, 1]} : vector<2x128xf32> to vector<2x32xf32>
    %cst_46 = arith.constant 2.000000e+00 : f32
    %197 = vector.broadcast %cst_46 : f32 to vector<2x32xf32>
    %198 = arith.mulf %197, %196 : vector<2x32xf32>
    %cst_47 = arith.constant 1.000000e+00 : f32
    %199 = vector.broadcast %cst_47 : f32 to vector<2x32xf32>
    %200 = arith.subf %198, %199 : vector<2x32xf32>
    %201 = arith.mulf %194, %153 : vector<2x32xf32>
    %202 = arith.mulf %193, %200 : vector<2x32xf32>
    %203 = arith.addf %201, %202 : vector<2x32xf32>
    %204 = math.tanh %203 : vector<2x32xf32>
    %205 = arith.mulf %195, %204 : vector<2x32xf32>
    %206 = arith.negf %187 : vector<2x128xf32>
    %207 = math.exp %206 : vector<2x128xf32>
    %cst_48 = arith.constant 1.000000e+00 : f32
    %208 = vector.broadcast %cst_48 : f32 to vector<2x128xf32>
    %209 = arith.addf %208, %207 : vector<2x128xf32>
    %210 = arith.divf %208, %209 : vector<2x128xf32>
    %211 = vector.extract_strided_slice %210 {offsets = [0, 0], sizes = [2, 32], strides = [1, 1]} : vector<2x128xf32> to vector<2x32xf32>
    %212 = vector.extract_strided_slice %210 {offsets = [0, 32], sizes = [2, 32], strides = [1, 1]} : vector<2x128xf32> to vector<2x32xf32>
    %213 = vector.extract_strided_slice %210 {offsets = [0, 64], sizes = [2, 32], strides = [1, 1]} : vector<2x128xf32> to vector<2x32xf32>
    %214 = vector.extract_strided_slice %210 {offsets = [0, 96], sizes = [2, 32], strides = [1, 1]} : vector<2x128xf32> to vector<2x32xf32>
    %cst_49 = arith.constant 2.000000e+00 : f32
    %215 = vector.broadcast %cst_49 : f32 to vector<2x32xf32>
    %216 = arith.mulf %215, %214 : vector<2x32xf32>
    %cst_50 = arith.constant 1.000000e+00 : f32
    %217 = vector.broadcast %cst_50 : f32 to vector<2x32xf32>
    %218 = arith.subf %216, %217 : vector<2x32xf32>
    %219 = arith.mulf %212, %171 : vector<2x32xf32>
    %220 = arith.mulf %211, %218 : vector<2x32xf32>
    %221 = arith.addf %219, %220 : vector<2x32xf32>
    %222 = math.tanh %221 : vector<2x32xf32>
    %223 = arith.mulf %213, %222 : vector<2x32xf32>
    %cst_51 = arith.constant dense<0.000000e+00> : vector<2x1xf32>
    %224 = tpu.matmul %223, %0, %cst_51 {dimension_numbers = #tpu.dot_dimension_numbers<[1], [0], [0], [1], [0, 0, 1, 1], [], []>} : vector<2x32xf32>, vector<32x1xf32>, vector<2x1xf32> -> vector<2x1xf32>
    %225 = vector.broadcast %2 : vector<1x1xf32> to vector<2x1xf32>
    %226 = arith.addf %224, %225 : vector<2x1xf32>
    %c3 = arith.constant 3 : index
    %c0_52 = arith.constant 0 : index
    %c0_53 = arith.constant 0 : index
    %227 = vector.load %arg4[%c3, %c0_52, %c0_53] : memref<8x2x1xf32, #tpu.memory_space<vmem>>, vector<1x2x1xf32>
    %228 = vector.shape_cast %227 : vector<1x2x1xf32> to vector<2x1xf32>
    %229 = vector.shape_cast %226 : vector<2x1xf32> to vector<1x2x1xf32>
    tpu.vector_store %arg4[%c3, %c0_52, %c0_53], %229 {strides = array<i32>} : memref<8x2x1xf32, #tpu.memory_space<vmem>>, vector<1x2x1xf32>,
    %230 = tpu.concatenate %205, %223 in 1 : vector<2x32xf32>, vector<2x32xf32> -> vector<2x64xf32>
    %231 = arith.truncf %230 : vector<2x64xf32> to vector<2x64xbf16>
    %cst_54 = arith.constant dense<0.000000e+00> : vector<2x256xf32>
    %232 = tpu.matmul %231, %9, %cst_54 {dimension_numbers = #tpu.dot_dimension_numbers<[1], [0], [0], [1], [0, 0, 1, 1], [], []>} : vector<2x64xbf16>, vector<64x256xbf16>, vector<2x256xf32> -> vector<2x256xf32>
    %233 = vector.extract_strided_slice %232 {offsets = [0, 0], sizes = [2, 128], strides = [1, 1]} : vector<2x256xf32> to vector<2x128xf32>
    %234 = vector.extract_strided_slice %7 {offsets = [10, 0], sizes = [2, 128], strides = [1, 1]} : vector<16x128xf32> to vector<2x128xf32>
    %235 = arith.addf %233, %234 : vector<2x128xf32>
    %236 = vector.extract_strided_slice %232 {offsets = [0, 128], sizes = [2, 128], strides = [1, 1]} : vector<2x256xf32> to vector<2x128xf32>
    %237 = arith.addf %236, %4 : vector<2x128xf32>
    %238 = arith.negf %235 : vector<2x128xf32>
    %239 = math.exp %238 : vector<2x128xf32>
    %cst_55 = arith.constant 1.000000e+00 : f32
    %240 = vector.broadcast %cst_55 : f32 to vector<2x128xf32>
    %241 = arith.addf %240, %239 : vector<2x128xf32>
    %242 = arith.divf %240, %241 : vector<2x128xf32>
    %243 = vector.extract_strided_slice %242 {offsets = [0, 0], sizes = [2, 32], strides = [1, 1]} : vector<2x128xf32> to vector<2x32xf32>
    %244 = vector.extract_strided_slice %242 {offsets = [0, 32], sizes = [2, 32], strides = [1, 1]} : vector<2x128xf32> to vector<2x32xf32>
    %245 = vector.extract_strided_slice %242 {offsets = [0, 64], sizes = [2, 32], strides = [1, 1]} : vector<2x128xf32> to vector<2x32xf32>
    %246 = vector.extract_strided_slice %242 {offsets = [0, 96], sizes = [2, 32], strides = [1, 1]} : vector<2x128xf32> to vector<2x32xf32>
    %cst_56 = arith.constant 2.000000e+00 : f32
    %247 = vector.broadcast %cst_56 : f32 to vector<2x32xf32>
    %248 = arith.mulf %247, %246 : vector<2x32xf32>
    %cst_57 = arith.constant 1.000000e+00 : f32
    %249 = vector.broadcast %cst_57 : f32 to vector<2x32xf32>
    %250 = arith.subf %248, %249 : vector<2x32xf32>
    %251 = arith.mulf %244, %203 : vector<2x32xf32>
    %252 = arith.mulf %243, %250 : vector<2x32xf32>
    %253 = arith.addf %251, %252 : vector<2x32xf32>
    %254 = math.tanh %253 : vector<2x32xf32>
    %255 = arith.mulf %245, %254 : vector<2x32xf32>
    %256 = arith.negf %237 : vector<2x128xf32>
    %257 = math.exp %256 : vector<2x128xf32>
    %cst_58 = arith.constant 1.000000e+00 : f32
    %258 = vector.broadcast %cst_58 : f32 to vector<2x128xf32>
    %259 = arith.addf %258, %257 : vector<2x128xf32>
    %260 = arith.divf %258, %259 : vector<2x128xf32>
    %261 = vector.extract_strided_slice %260 {offsets = [0, 0], sizes = [2, 32], strides = [1, 1]} : vector<2x128xf32> to vector<2x32xf32>
    %262 = vector.extract_strided_slice %260 {offsets = [0, 32], sizes = [2, 32], strides = [1, 1]} : vector<2x128xf32> to vector<2x32xf32>
    %263 = vector.extract_strided_slice %260 {offsets = [0, 64], sizes = [2, 32], strides = [1, 1]} : vector<2x128xf32> to vector<2x32xf32>
    %264 = vector.extract_strided_slice %260 {offsets = [0, 96], sizes = [2, 32], strides = [1, 1]} : vector<2x128xf32> to vector<2x32xf32>
    %cst_59 = arith.constant 2.000000e+00 : f32
    %265 = vector.broadcast %cst_59 : f32 to vector<2x32xf32>
    %266 = arith.mulf %265, %264 : vector<2x32xf32>
    %cst_60 = arith.constant 1.000000e+00 : f32
    %267 = vector.broadcast %cst_60 : f32 to vector<2x32xf32>
    %268 = arith.subf %266, %267 : vector<2x32xf32>
    %269 = arith.mulf %262, %221 : vector<2x32xf32>
    %270 = arith.mulf %261, %268 : vector<2x32xf32>
    %271 = arith.addf %269, %270 : vector<2x32xf32>
    %272 = math.tanh %271 : vector<2x32xf32>
    %273 = arith.mulf %263, %272 : vector<2x32xf32>
    %cst_61 = arith.constant dense<0.000000e+00> : vector<2x1xf32>
    %274 = tpu.matmul %273, %0, %cst_61 {dimension_numbers = #tpu.dot_dimension_numbers<[1], [0], [0], [1], [0, 0, 1, 1], [], []>} : vector<2x32xf32>, vector<32x1xf32>, vector<2x1xf32> -> vector<2x1xf32>
    %275 = vector.broadcast %2 : vector<1x1xf32> to vector<2x1xf32>
    %276 = arith.addf %274, %275 : vector<2x1xf32>
    %c4 = arith.constant 4 : index
    %c0_62 = arith.constant 0 : index
    %c0_63 = arith.constant 0 : index
    %277 = vector.load %arg4[%c4, %c0_62, %c0_63] : memref<8x2x1xf32, #tpu.memory_space<vmem>>, vector<1x2x1xf32>
    %278 = vector.shape_cast %277 : vector<1x2x1xf32> to vector<2x1xf32>
    %279 = vector.shape_cast %276 : vector<2x1xf32> to vector<1x2x1xf32>
    tpu.vector_store %arg4[%c4, %c0_62, %c0_63], %279 {strides = array<i32>} : memref<8x2x1xf32, #tpu.memory_space<vmem>>, vector<1x2x1xf32>,
    %280 = tpu.concatenate %255, %273 in 1 : vector<2x32xf32>, vector<2x32xf32> -> vector<2x64xf32>
    %281 = arith.truncf %280 : vector<2x64xf32> to vector<2x64xbf16>
    %cst_64 = arith.constant dense<0.000000e+00> : vector<2x256xf32>
    %282 = tpu.matmul %281, %9, %cst_64 {dimension_numbers = #tpu.dot_dimension_numbers<[1], [0], [0], [1], [0, 0, 1, 1], [], []>} : vector<2x64xbf16>, vector<64x256xbf16>, vector<2x256xf32> -> vector<2x256xf32>
    %283 = vector.extract_strided_slice %282 {offsets = [0, 0], sizes = [2, 128], strides = [1, 1]} : vector<2x256xf32> to vector<2x128xf32>
    %284 = vector.extract_strided_slice %7 {offsets = [12, 0], sizes = [2, 128], strides = [1, 1]} : vector<16x128xf32> to vector<2x128xf32>
    %285 = arith.addf %283, %284 : vector<2x128xf32>
    %286 = vector.extract_strided_slice %282 {offsets = [0, 128], sizes = [2, 128], strides = [1, 1]} : vector<2x256xf32> to vector<2x128xf32>
    %287 = arith.addf %286, %4 : vector<2x128xf32>
    %288 = arith.negf %285 : vector<2x128xf32>
    %289 = math.exp %288 : vector<2x128xf32>
    %cst_65 = arith.constant 1.000000e+00 : f32
    %290 = vector.broadcast %cst_65 : f32 to vector<2x128xf32>
    %291 = arith.addf %290, %289 : vector<2x128xf32>
    %292 = arith.divf %290, %291 : vector<2x128xf32>
    %293 = vector.extract_strided_slice %292 {offsets = [0, 0], sizes = [2, 32], strides = [1, 1]} : vector<2x128xf32> to vector<2x32xf32>
    %294 = vector.extract_strided_slice %292 {offsets = [0, 32], sizes = [2, 32], strides = [1, 1]} : vector<2x128xf32> to vector<2x32xf32>
    %295 = vector.extract_strided_slice %292 {offsets = [0, 64], sizes = [2, 32], strides = [1, 1]} : vector<2x128xf32> to vector<2x32xf32>
    %296 = vector.extract_strided_slice %292 {offsets = [0, 96], sizes = [2, 32], strides = [1, 1]} : vector<2x128xf32> to vector<2x32xf32>
    %cst_66 = arith.constant 2.000000e+00 : f32
    %297 = vector.broadcast %cst_66 : f32 to vector<2x32xf32>
    %298 = arith.mulf %297, %296 : vector<2x32xf32>
    %cst_67 = arith.constant 1.000000e+00 : f32
    %299 = vector.broadcast %cst_67 : f32 to vector<2x32xf32>
    %300 = arith.subf %298, %299 : vector<2x32xf32>
    %301 = arith.mulf %294, %253 : vector<2x32xf32>
    %302 = arith.mulf %293, %300 : vector<2x32xf32>
    %303 = arith.addf %301, %302 : vector<2x32xf32>
    %304 = math.tanh %303 : vector<2x32xf32>
    %305 = arith.mulf %295, %304 : vector<2x32xf32>
    %306 = arith.negf %287 : vector<2x128xf32>
    %307 = math.exp %306 : vector<2x128xf32>
    %cst_68 = arith.constant 1.000000e+00 : f32
    %308 = vector.broadcast %cst_68 : f32 to vector<2x128xf32>
    %309 = arith.addf %308, %307 : vector<2x128xf32>
    %310 = arith.divf %308, %309 : vector<2x128xf32>
    %311 = vector.extract_strided_slice %310 {offsets = [0, 0], sizes = [2, 32], strides = [1, 1]} : vector<2x128xf32> to vector<2x32xf32>
    %312 = vector.extract_strided_slice %310 {offsets = [0, 32], sizes = [2, 32], strides = [1, 1]} : vector<2x128xf32> to vector<2x32xf32>
    %313 = vector.extract_strided_slice %310 {offsets = [0, 64], sizes = [2, 32], strides = [1, 1]} : vector<2x128xf32> to vector<2x32xf32>
    %314 = vector.extract_strided_slice %310 {offsets = [0, 96], sizes = [2, 32], strides = [1, 1]} : vector<2x128xf32> to vector<2x32xf32>
    %cst_69 = arith.constant 2.000000e+00 : f32
    %315 = vector.broadcast %cst_69 : f32 to vector<2x32xf32>
    %316 = arith.mulf %315, %314 : vector<2x32xf32>
    %cst_70 = arith.constant 1.000000e+00 : f32
    %317 = vector.broadcast %cst_70 : f32 to vector<2x32xf32>
    %318 = arith.subf %316, %317 : vector<2x32xf32>
    %319 = arith.mulf %312, %271 : vector<2x32xf32>
    %320 = arith.mulf %311, %318 : vector<2x32xf32>
    %321 = arith.addf %319, %320 : vector<2x32xf32>
    %322 = math.tanh %321 : vector<2x32xf32>
    %323 = arith.mulf %313, %322 : vector<2x32xf32>
    %cst_71 = arith.constant dense<0.000000e+00> : vector<2x1xf32>
    %324 = tpu.matmul %323, %0, %cst_71 {dimension_numbers = #tpu.dot_dimension_numbers<[1], [0], [0], [1], [0, 0, 1, 1], [], []>} : vector<2x32xf32>, vector<32x1xf32>, vector<2x1xf32> -> vector<2x1xf32>
    %325 = vector.broadcast %2 : vector<1x1xf32> to vector<2x1xf32>
    %326 = arith.addf %324, %325 : vector<2x1xf32>
    %c5 = arith.constant 5 : index
    %c0_72 = arith.constant 0 : index
    %c0_73 = arith.constant 0 : index
    %327 = vector.load %arg4[%c5, %c0_72, %c0_73] : memref<8x2x1xf32, #tpu.memory_space<vmem>>, vector<1x2x1xf32>
    %328 = vector.shape_cast %327 : vector<1x2x1xf32> to vector<2x1xf32>
    %329 = vector.shape_cast %326 : vector<2x1xf32> to vector<1x2x1xf32>
    tpu.vector_store %arg4[%c5, %c0_72, %c0_73], %329 {strides = array<i32>} : memref<8x2x1xf32, #tpu.memory_space<vmem>>, vector<1x2x1xf32>,
    %330 = tpu.concatenate %305, %323 in 1 : vector<2x32xf32>, vector<2x32xf32> -> vector<2x64xf32>
    %331 = arith.truncf %330 : vector<2x64xf32> to vector<2x64xbf16>
    %cst_74 = arith.constant dense<0.000000e+00> : vector<2x256xf32>
    %332 = tpu.matmul %331, %9, %cst_74 {dimension_numbers = #tpu.dot_dimension_numbers<[1], [0], [0], [1], [0, 0, 1, 1], [], []>} : vector<2x64xbf16>, vector<64x256xbf16>, vector<2x256xf32> -> vector<2x256xf32>
    %333 = vector.extract_strided_slice %332 {offsets = [0, 0], sizes = [2, 128], strides = [1, 1]} : vector<2x256xf32> to vector<2x128xf32>
    %334 = vector.extract_strided_slice %7 {offsets = [14, 0], sizes = [2, 128], strides = [1, 1]} : vector<16x128xf32> to vector<2x128xf32>
    %335 = arith.addf %333, %334 : vector<2x128xf32>
    %336 = vector.extract_strided_slice %332 {offsets = [0, 128], sizes = [2, 128], strides = [1, 1]} : vector<2x256xf32> to vector<2x128xf32>
    %337 = arith.addf %336, %4 : vector<2x128xf32>
    %338 = arith.negf %335 : vector<2x128xf32>
    %339 = math.exp %338 : vector<2x128xf32>
    %cst_75 = arith.constant 1.000000e+00 : f32
    %340 = vector.broadcast %cst_75 : f32 to vector<2x128xf32>
    %341 = arith.addf %340, %339 : vector<2x128xf32>
    %342 = arith.divf %340, %341 : vector<2x128xf32>
    %343 = vector.extract_strided_slice %342 {offsets = [0, 0], sizes = [2, 32], strides = [1, 1]} : vector<2x128xf32> to vector<2x32xf32>
    %344 = vector.extract_strided_slice %342 {offsets = [0, 32], sizes = [2, 32], strides = [1, 1]} : vector<2x128xf32> to vector<2x32xf32>
    %345 = vector.extract_strided_slice %342 {offsets = [0, 64], sizes = [2, 32], strides = [1, 1]} : vector<2x128xf32> to vector<2x32xf32>
    %346 = vector.extract_strided_slice %342 {offsets = [0, 96], sizes = [2, 32], strides = [1, 1]} : vector<2x128xf32> to vector<2x32xf32>
    %cst_76 = arith.constant 2.000000e+00 : f32
    %347 = vector.broadcast %cst_76 : f32 to vector<2x32xf32>
    %348 = arith.mulf %347, %346 : vector<2x32xf32>
    %cst_77 = arith.constant 1.000000e+00 : f32
    %349 = vector.broadcast %cst_77 : f32 to vector<2x32xf32>
    %350 = arith.subf %348, %349 : vector<2x32xf32>
    %351 = arith.mulf %344, %303 : vector<2x32xf32>
    %352 = arith.mulf %343, %350 : vector<2x32xf32>
    %353 = arith.addf %351, %352 : vector<2x32xf32>
    %354 = math.tanh %353 : vector<2x32xf32>
    %355 = arith.mulf %345, %354 : vector<2x32xf32>
    %356 = arith.negf %337 : vector<2x128xf32>
    %357 = math.exp %356 : vector<2x128xf32>
    %cst_78 = arith.constant 1.000000e+00 : f32
    %358 = vector.broadcast %cst_78 : f32 to vector<2x128xf32>
    %359 = arith.addf %358, %357 : vector<2x128xf32>
    %360 = arith.divf %358, %359 : vector<2x128xf32>
    %361 = vector.extract_strided_slice %360 {offsets = [0, 0], sizes = [2, 32], strides = [1, 1]} : vector<2x128xf32> to vector<2x32xf32>
    %362 = vector.extract_strided_slice %360 {offsets = [0, 32], sizes = [2, 32], strides = [1, 1]} : vector<2x128xf32> to vector<2x32xf32>
    %363 = vector.extract_strided_slice %360 {offsets = [0, 64], sizes = [2, 32], strides = [1, 1]} : vector<2x128xf32> to vector<2x32xf32>
    %364 = vector.extract_strided_slice %360 {offsets = [0, 96], sizes = [2, 32], strides = [1, 1]} : vector<2x128xf32> to vector<2x32xf32>
    %cst_79 = arith.constant 2.000000e+00 : f32
    %365 = vector.broadcast %cst_79 : f32 to vector<2x32xf32>
    %366 = arith.mulf %365, %364 : vector<2x32xf32>
    %cst_80 = arith.constant 1.000000e+00 : f32
    %367 = vector.broadcast %cst_80 : f32 to vector<2x32xf32>
    %368 = arith.subf %366, %367 : vector<2x32xf32>
    %369 = arith.mulf %362, %321 : vector<2x32xf32>
    %370 = arith.mulf %361, %368 : vector<2x32xf32>
    %371 = arith.addf %369, %370 : vector<2x32xf32>
    %372 = math.tanh %371 : vector<2x32xf32>
    %373 = arith.mulf %363, %372 : vector<2x32xf32>
    %cst_81 = arith.constant dense<0.000000e+00> : vector<2x1xf32>
    %374 = tpu.matmul %373, %0, %cst_81 {dimension_numbers = #tpu.dot_dimension_numbers<[1], [0], [0], [1], [0, 0, 1, 1], [], []>} : vector<2x32xf32>, vector<32x1xf32>, vector<2x1xf32> -> vector<2x1xf32>
    %375 = vector.broadcast %2 : vector<1x1xf32> to vector<2x1xf32>
    %376 = arith.addf %374, %375 : vector<2x1xf32>
    %c6 = arith.constant 6 : index
    %c0_82 = arith.constant 0 : index
    %c0_83 = arith.constant 0 : index
    %377 = vector.load %arg4[%c6, %c0_82, %c0_83] : memref<8x2x1xf32, #tpu.memory_space<vmem>>, vector<1x2x1xf32>
    %378 = vector.shape_cast %377 : vector<1x2x1xf32> to vector<2x1xf32>
    %379 = vector.shape_cast %376 : vector<2x1xf32> to vector<1x2x1xf32>
    tpu.vector_store %arg4[%c6, %c0_82, %c0_83], %379 {strides = array<i32>} : memref<8x2x1xf32, #tpu.memory_space<vmem>>, vector<1x2x1xf32>,
    %380 = tpu.concatenate %355, %373 in 1 : vector<2x32xf32>, vector<2x32xf32> -> vector<2x64xf32>
    %381 = arith.truncf %380 : vector<2x64xf32> to vector<2x64xbf16>
    %cst_84 = arith.constant dense<0.000000e+00> : vector<2x256xf32>
    %382 = tpu.matmul %381, %9, %cst_84 {dimension_numbers = #tpu.dot_dimension_numbers<[1], [0], [0], [1], [0, 0, 1, 1], [], []>} : vector<2x64xbf16>, vector<64x256xbf16>, vector<2x256xf32> -> vector<2x256xf32>
    %383 = vector.extract_strided_slice %382 {offsets = [0, 128], sizes = [2, 128], strides = [1, 1]} : vector<2x256xf32> to vector<2x128xf32>
    %384 = arith.addf %383, %4 : vector<2x128xf32>
    %385 = arith.negf %384 : vector<2x128xf32>
    %386 = math.exp %385 : vector<2x128xf32>
    %cst_85 = arith.constant 1.000000e+00 : f32
    %387 = vector.broadcast %cst_85 : f32 to vector<2x128xf32>
    %388 = arith.addf %387, %386 : vector<2x128xf32>
    %389 = arith.divf %387, %388 : vector<2x128xf32>
    %390 = vector.extract_strided_slice %389 {offsets = [0, 0], sizes = [2, 32], strides = [1, 1]} : vector<2x128xf32> to vector<2x32xf32>
    %391 = vector.extract_strided_slice %389 {offsets = [0, 32], sizes = [2, 32], strides = [1, 1]} : vector<2x128xf32> to vector<2x32xf32>
    %392 = vector.extract_strided_slice %389 {offsets = [0, 64], sizes = [2, 32], strides = [1, 1]} : vector<2x128xf32> to vector<2x32xf32>
    %393 = vector.extract_strided_slice %389 {offsets = [0, 96], sizes = [2, 32], strides = [1, 1]} : vector<2x128xf32> to vector<2x32xf32>
    %cst_86 = arith.constant 2.000000e+00 : f32
    %394 = vector.broadcast %cst_86 : f32 to vector<2x32xf32>
    %395 = arith.mulf %394, %393 : vector<2x32xf32>
    %cst_87 = arith.constant 1.000000e+00 : f32
    %396 = vector.broadcast %cst_87 : f32 to vector<2x32xf32>
    %397 = arith.subf %395, %396 : vector<2x32xf32>
    %398 = arith.mulf %391, %371 : vector<2x32xf32>
    %399 = arith.mulf %390, %397 : vector<2x32xf32>
    %400 = arith.addf %398, %399 : vector<2x32xf32>
    %401 = math.tanh %400 : vector<2x32xf32>
    %402 = arith.mulf %392, %401 : vector<2x32xf32>
    %cst_88 = arith.constant dense<0.000000e+00> : vector<2x1xf32>
    %403 = tpu.matmul %402, %0, %cst_88 {dimension_numbers = #tpu.dot_dimension_numbers<[1], [0], [0], [1], [0, 0, 1, 1], [], []>} : vector<2x32xf32>, vector<32x1xf32>, vector<2x1xf32> -> vector<2x1xf32>
    %404 = vector.broadcast %2 : vector<1x1xf32> to vector<2x1xf32>
    %405 = arith.addf %403, %404 : vector<2x1xf32>
    %c7 = arith.constant 7 : index
    %c0_89 = arith.constant 0 : index
    %c0_90 = arith.constant 0 : index
    %406 = vector.load %arg4[%c7, %c0_89, %c0_90] : memref<8x2x1xf32, #tpu.memory_space<vmem>>, vector<1x2x1xf32>
    %407 = vector.shape_cast %406 : vector<1x2x1xf32> to vector<2x1xf32>
    %408 = vector.shape_cast %405 : vector<2x1xf32> to vector<1x2x1xf32>
    tpu.vector_store %arg4[%c7, %c0_89, %c0_90], %408 {strides = array<i32>} : memref<8x2x1xf32, #tpu.memory_space<vmem>>, vector<1x2x1xf32>,
    %c0_91 = arith.constant 0 : index
    %c0_92 = arith.constant 0 : index
    %c0_93 = arith.constant 0 : index
    %409 = vector.load %arg5[%c0_91, %c0_92, %c0_93] : memref<4x2x32xf32, #tpu.memory_space<vmem>>, vector<1x2x32xf32>
    %410 = vector.shape_cast %409 : vector<1x2x32xf32> to vector<2x32xf32>
    %411 = vector.shape_cast %355 : vector<2x32xf32> to vector<1x2x32xf32>
    tpu.vector_store %arg5[%c0_91, %c0_92, %c0_93], %411 {strides = array<i32>} : memref<4x2x32xf32, #tpu.memory_space<vmem>>, vector<1x2x32xf32>,
    %c1_94 = arith.constant 1 : index
    %c0_95 = arith.constant 0 : index
    %c0_96 = arith.constant 0 : index
    %412 = vector.load %arg5[%c1_94, %c0_95, %c0_96] : memref<4x2x32xf32, #tpu.memory_space<vmem>>, vector<1x2x32xf32>
    %413 = vector.shape_cast %412 : vector<1x2x32xf32> to vector<2x32xf32>
    %414 = vector.shape_cast %402 : vector<2x32xf32> to vector<1x2x32xf32>
    tpu.vector_store %arg5[%c1_94, %c0_95, %c0_96], %414 {strides = array<i32>} : memref<4x2x32xf32, #tpu.memory_space<vmem>>, vector<1x2x32xf32>,
    %c2_97 = arith.constant 2 : index
    %c0_98 = arith.constant 0 : index
    %c0_99 = arith.constant 0 : index
    %415 = vector.load %arg5[%c2_97, %c0_98, %c0_99] : memref<4x2x32xf32, #tpu.memory_space<vmem>>, vector<1x2x32xf32>
    %416 = vector.shape_cast %415 : vector<1x2x32xf32> to vector<2x32xf32>
    %417 = vector.shape_cast %353 : vector<2x32xf32> to vector<1x2x32xf32>
    tpu.vector_store %arg5[%c2_97, %c0_98, %c0_99], %417 {strides = array<i32>} : memref<4x2x32xf32, #tpu.memory_space<vmem>>, vector<1x2x32xf32>,
    %c3_100 = arith.constant 3 : index
    %c0_101 = arith.constant 0 : index
    %c0_102 = arith.constant 0 : index
    %418 = vector.load %arg5[%c3_100, %c0_101, %c0_102] : memref<4x2x32xf32, #tpu.memory_space<vmem>>, vector<1x2x32xf32>
    %419 = vector.shape_cast %418 : vector<1x2x32xf32> to vector<2x32xf32>
    %420 = vector.shape_cast %400 : vector<2x32xf32> to vector<1x2x32xf32>
    tpu.vector_store %arg5[%c3_100, %c0_101, %c0_102], %420 {strides = array<i32>} : memref<4x2x32xf32, #tpu.memory_space<vmem>>, vector<1x2x32xf32>,
    return
  }
}

</mosaic_0001>

<bundles_post_ra>
// kernel: tpu_custom_call.1
= control target key start
LH: loop header
LB: loop body
LE: loop exit
PB: predicated region body
PF: predicated region fallthrough
CT: control target
= control target key end

     0   :  { %11 = vsyncpa [#allocation3], 0  ;;  %s1979_s0 = inlined_call_operand.vmem [shape: f32[16,5], index: 0, kind: input, shape index: {}]   ;;  %s1980_s1 = inlined_call_operand.vmem [shape: f32[5,128], index: 1, kind: input, shape index: {}]   ;;  %s1981_s2 = inlined_call_operand.hbm [shape: f32[64,256], index: 2, kind: input, shape index: {}]   ;;  %s1982_s3 = inlined_call_operand.hbm [shape: f32[34,128], index: 3, kind: input, shape index: {}]   ;;  %s1983_s4 = inlined_call_operand.vmem [shape: f32[8,2,1], index: 4, kind: output, shape index: {0}]   ;;  %s1984_s5 = inlined_call_operand.hbm [shape: f32[4,2,32], index: 5, kind: output, shape index: {1}]  }
   0x1   :  { %12 = vsyncpa [#allocation6], 0 }
   0x2   :  { %13 = vsyncpa [#allocation4], 0  ;;  %s22_s20 = sshll.u32 %s1981_s2, 4  ;;  %s1560_s21 = smov [#allocation2]   ;;  %s23_s20 = int_to_ptr.hbm [resolvable:$true] %s22_s20 }
   0x3   :  { %s24_s22 = sshll.u32 %s1560_s21, 4  ;;  %s35_s25 = sshll.u32 %s1982_s3, 4  ;;  %s25_s22 = int_to_ptr.vmem [resolvable:$true] %s24_s22  ;;  %s36_s25 = int_to_ptr.hbm [resolvable:$true] %s35_s25 }
   0x4   :  { %s1561_s26 = smov 256   ;;  %s1562_s27 = smov 16  }
   0x5   :  { %30 = dma.hbm_to_vmem [thread:$0]  %s23_s20, 2048, %s25_s22, [#allocation3], %s1561_s26, %s1561_s26, %s1562_s27  }
   0x6   :  { %s1563_s28 = smov [#allocation5]   ;;  %s1564_s30 = smov 128  }
   0x7   :  { %s37_s29 = sshll.u32 %s1563_s28, 4  ;;  %s1565_s6 = smov 8   ;;  %s38_s29 = int_to_ptr.vmem [resolvable:$true] %s37_s29 }
   0x8   :  { %43 = dma.hbm_to_vmem [thread:$0]  %s36_s25, 640, %s38_s29, [#allocation6], %s1564_s30, %s1564_s30, %s1565_s6  }
   0x9   :  { %1554 = dma.done.wait [#allocation3], 2048  }
   0xa   :  { %1555 = vsyncadd [#allocation3], 4294965248 }
   0xb   :  { %1556 = dma.done.wait [#allocation6], 640  }
   0xc   :  { %1557 = vsyncadd [#allocation6], 4294966656  ;;  %vm70_vm0 = vcmask 1044480   ;;  %vm63_vm1 = vcmask 39936   ;;  %v62_v0 = vld [vmem:[%s1980_s1] sm:$0x1f] }
   0xd   :  { %v60_v1 = vld [vmem:[%s1979_s0] sm:$0xff]  ;;  %1306 = vmatpush.msk.msra.mxu0 %vm70_vm0, %v62_v0  ;;  %s1566_s1 = smov 32   ;;  %v111_v25 = vld [vmem:[#allocation2 + $0x70] sm:$0xff]  ;;  %v110_v26 = vld [vmem:[#allocation2 + $0x68] sm:$0xff]  ;;  %s1567_s9 = smov 64   ;;  %vm163_vm6 = vcmask 261120  }
   0xe   :  { %1307 = vmatmul.msk.f32.vlgmr.msra.gmra.mxu0 %vm63_vm1, %v60_v1  ;;  %v109_v24 = vld [vmem:[#allocation2 + $0x60] sm:$0xff]  ;;  %v112_v28 = vld [vmem:[#allocation2 + $0x78] sm:$0xff]  ;;  %v107_v30 = vld [vmem:[#allocation2 + $0x50] sm:$0xff]  ;;  %vm166_vm7 = vcmask 523264   ;;  %s1568_s10 = smov 96   ;;  %vm303_vm0 = vcmask 1024  }
   0xf   :  { %v1623_v27 = vpack.c.bf16 %v111_v25, %v109_v24  ;;  %v105_v29 = vld [vmem:[#allocation2 + $0x40] sm:$0xff]  ;;  %v1625_v31 = vpack.c.bf16 %v112_v28, %v110_v26  ;;  %v106_v32 = vld [vmem:[#allocation2 + $0x48] sm:$0xff]  ;;  %v108_v33 = vld [vmem:[#allocation2 + $0x58] sm:$0xff]  ;;  %s1569_s26 = smov [#allocation7]   ;;  %s1290_s30 = sshll.u32 %s1984_s5, 4  ;;  %s1291_s30 = int_to_ptr.hbm [resolvable:$true] %s1290_s30 }
  0x10   :  { %v1628_v34 = vpack.c.bf16 %v107_v30, %v105_v29  ;;  %v1632_v35 = vpack.c.bf16 %v108_v33, %v106_v32  ;;  %v101_v36 = vld [vmem:[#allocation2 + $0x20] sm:$0xff]  ;;  %v103_v37 = vld [vmem:[#allocation2 + $0x30] sm:$0xff]  ;;  %v102_v38 = vld [vmem:[#allocation2 + $0x28] sm:$0xff]  ;;  %s1288_s27 = sshll.u32 %s1569_s26, 4  ;;  %s1570_s6 = smov 2   ;;  %s1289_s27 = int_to_ptr.vmem [resolvable:$true] %s1288_s27 }
  0x11   :  { %174 = vmatpush.bf16.msra.mxu1 %v1623_v27  ;;  %321 = vmatpush.bf16.msrb.mxu0 %v1623_v27  ;;  %v104_v39 = vld [vmem:[#allocation2 + $0x38] sm:$0xff]  ;;  %v1635_v40 = vpack.c.bf16 %v103_v37, %v101_v36  ;;  %v97_v44 = vld [vmem:[#allocation2] sm:$0xff]  ;;  %v99_v45 = vld [vmem:[#allocation2 + $0x10] sm:$0xff] }
  0x12   :  { %187 = vmatpush.bf16.msra.mxu2 %v1625_v31  ;;  %v1639_v41 = vpack.c.bf16 %v104_v39, %v102_v38  ;;  %v98_v46 = vld [vmem:[#allocation2 + $0x8] sm:$0xff]  ;;  %v1645_v47 = vpack.c.bf16 %v99_v45, %v97_v44  ;;  %v100_v48 = vld [vmem:[#allocation2 + $0x18] sm:$0xff]  ;;  %v1668_v57 = vld [vmem:[#allocation5 + $0x20] ss:$0 sm:$0xff] }
  0x13   :  { %v1647_v49 = vpack.c.bf16 %v100_v48, %v98_v46 }
  0x15   :  { %175 = vmatpush.bf16.msra.mxu1 %v1628_v34  ;;  %322 = vmatpush.bf16.msrb.mxu0 %v1628_v34 }
  0x16   :  { %188 = vmatpush.bf16.msra.mxu2 %v1632_v35 }
  0x19   :  { %176 = vmatpush.bf16.msra.mxu1 %v1635_v40  ;;  %323 = vmatpush.bf16.msrb.mxu0 %v1635_v40 }
  0x1a   :  { %189 = vmatpush.bf16.msra.mxu2 %v1639_v41 }
  0x1d   :  { %177 = vmatpush.bf16.msra.mxu1 %v1645_v47  ;;  %324 = vmatpush.bf16.msrb.mxu0 %v1645_v47 }
  0x1e   :  { %190 = vmatpush.bf16.msra.mxu2 %v1647_v49 }
  0x21   :  { %479 = vmatpush.bf16.msra.mxu0 %v1625_v31 }
  0x22   :  { %466 = vmatpush.bf16.msrb.mxu2 %v1623_v27 }
  0x25   :  { %480 = vmatpush.bf16.msra.mxu0 %v1632_v35 }
  0x26   :  { %467 = vmatpush.bf16.msrb.mxu2 %v1628_v34 }
  0x29   :  { %481 = vmatpush.bf16.msra.mxu0 %v1639_v41 }
  0x2a   :  { %468 = vmatpush.bf16.msrb.mxu2 %v1635_v40 }
  0x2d   :  { %482 = vmatpush.bf16.msra.mxu0 %v1647_v49 }
  0x2e   :  { %469 = vmatpush.bf16.msrb.mxu2 %v1645_v47 }
  0x8b   :  { %v1614_v2 = vpop.f32.mrf.mxu0 }
  0x8c   :  { %v1309_v3 = vmul.f32 -1.442695, %v1614_v2  ;;  %v197_v53 = vrot.slane %v1614_v2, 2 }
  0x8e   :  { %1384 = vpow2.f32 %v1309_v3 }
  0x94   :  { %v1385_v4 = vpop.eup %1384 }
  0x95   :  { %v124_v5 = vadd.f32 1.0, %v1385_v4 }
  0x97   :  { %1386 = vrcp.f32 %v124_v5  ;;  %v136_v9 = vand.u32 2147483648, %v124_v5  ;;  %v134_v11 = vand.u32 2147483647, %v124_v5  ;;  %vm130_vm3 = vweird.f32 %v124_v5 }
  0x99   :  { %v137_v13 = vor.u32 1.1754944e-38, %v136_v9  ;;  %vm135_vm5 = vcmp.eq.f32.partialorder %v134_v11, 8.507059e+37 }
  0x9d   :  { %v1387_v6 = vpop.eup %1386 }
  0x9e   :  { %v126_v7 = vmul.f32 %v1387_v6, %v124_v5  ;;  %vm131_vm2 = vweird.f32 %v1387_v6 }
  0x9f   :  { %vm132_vm4 = vmor %vm130_vm3, %vm131_vm2 }
  0xa0   :  { %v127_v8 = vsub.f32 1.0, %v126_v7 }
  0xa2   :  { %v128_v10 = vmul.f32 %v1387_v6, %v127_v8 }
  0xa4   :  { %v129_v12 = vadd.f32 %v1387_v6, %v128_v10 }
  0xa6   :  { %v133_v14 = vsel %vm132_vm4, %v1387_v6, %v129_v12 }
  0xa7   :  { %v138_v15 = vsel %vm135_vm5, %v137_v13, %v133_v14 }
  0xa8   :  { %v140_v16 = vmul.f32 2.0, %v138_v15  ;;  %v142_v20 = vmul.f32 0.0, %v138_v15 }
  0xaa   :  { %v1310_v17 = vadd.f32 -1.0, %v140_v16 }
  0xac   :  { %144 = vrot.lane.b32.xlu0 %v1310_v17, %s1566_s1 }
 0x11e   :  { %v145_v18 = vpop.permute.xlu0 %144 }
 0x11f   :  { %v147_v19 = vmul.f32 %v145_v18, %v138_v15 }
 0x121   :  { %149 = vrot.lane.b32.xlu0 %v147_v19, %s1566_s1 }
 0x193   :  { %v150_v21 = vpop.permute.xlu0 %149 }
 0x194   :  { %v1619_v22 = vadd.f32 %v150_v21, %v142_v20 }
 0x196   :  { %1388 = vtanh.f32 %v1619_v22 }
 0x19c   :  { %v1389_v23 = vpop.eup %1388 }
 0x19d   :  { %155 = vrot.lane.b32.xlu1 %v1389_v23, %s1566_s1 }
 0x20f   :  { %v156_v42 = vpop.permute.xlu1 %155 }
 0x210   :  { %v158_v43 = vmul.f32 %v156_v42, %v138_v15 }
 0x212   :  { %160 = vrot.lane.b32.xlu1 %v158_v43, %s1567_s9 }
 0x284   :  { %v161_v50 = vpop.permute.xlu1 %160 }
 0x285   :  { %v164_v51 = vsel %vm163_vm6, %v161_v50, 0.0 }
 0x286   :  { %v165_v52 = vpack.c.bf16 %v164_v51, %v164_v51  ;;  %v1686_v51 = vld [vmem:[#allocation5 + $0x18] sm:$0xff] }
 0x287   :  { %295 = vmatpush.msra.mxu3 %v1686_v51  ;;  %440 = vmatpush.msrb.mxu1 %v1686_v51 }
 0x288   :  { %1311 = vmatmul.msk.bf16.vlgmr.msra.gmra.mxu1 %vm166_vm7, %v165_v52  ;;  %1312 = vmatmul.msk.bf16.vlgmr.msra.gmra.mxu2 %vm166_vm7, %v165_v52  ;;  %v1692_v52 = vld [vmem:[#allocation5 + $0x8] sm:$0xff] }
 0x289   :  { %624 = vmatpush.bf16.msra.mxu2 %v1625_v31 }
 0x28d   :  { %625 = vmatpush.bf16.msra.mxu2 %v1632_v35 }
 0x291   :  { %626 = vmatpush.bf16.msra.mxu2 %v1639_v41 }
 0x295   :  { %627 = vmatpush.bf16.msra.mxu2 %v1647_v49 }
 0x305   :  { %v179_v54 = vpop.f32.mrf.mxu1 }
 0x306   :  { %v199_v55 = vadd.f32 %v197_v53, %v179_v54  ;;  %v1696_v53 = vld [vmem:[#allocation5] sm:$0xff] }
 0x308   :  { %v1313_v56 = vmul.f32 -1.442695, %v199_v55 }
 0x30a   :  { %1390 = vpow2.f32 %v1313_v56  ;;  %v61_v56 = vld [vmem:[%s1979_s0 + $0x8] sm:$0xff] }
 0x30b   :  { %v192_v58 = vpop.f32.mrf.mxu2  ;;  %1308 = vmatmul.msk.f32.gmra.mxu0 %vm63_vm1, %v61_v56 }
 0x30c   :  { %v200_v59 = vadd.f32 %v1668_v57, %v192_v58 }
 0x30d   :  { %v181_v60 = vpop.f32.mrf.mxu1 }
 0x30e   :  { %v1315_v61 = vmul.f32 -1.442695, %v200_v59 }
 0x310   :  { %v1391_v62 = vpop.eup %1390  ;;  %1392 = vpow2.f32 %v1315_v61 }
 0x311   :  { %v204_v63 = vadd.f32 1.0, %v1391_v62 }
 0x313   :  { %1394 = vrcp.f32 %v204_v63  ;;  %v194_v0 = vpop.f32.mrf.mxu2  ;;  %v216_v17 = vand.u32 2147483648, %v204_v63  ;;  %vm210_vm13 = vweird.f32 %v204_v63  ;;  %v214_v19 = vand.u32 2147483647, %v204_v63 }
 0x314   :  { %v1733_v0 = vld [vmem:[#allocation5 + $0x21] ss:$0 sm:$0xff] }
 0x315   :  { %v217_v24 = vor.u32 1.1754944e-38, %v216_v17  ;;  %vm215_vm15 = vcmp.eq.f32.partialorder %v214_v19, 8.507059e+37 }
 0x316   :  { %v1393_v1 = vpop.eup %1392 }
 0x317   :  { %v242_v3 = vadd.f32 1.0, %v1393_v1 }
 0x319   :  { %v1395_v4 = vpop.eup %1394  ;;  %1396 = vrcp.f32 %v242_v3  ;;  %v254_v11 = vand.u32 2147483648, %v242_v3  ;;  %v252_v13 = vand.u32 2147483647, %v242_v3  ;;  %vm248_vm9 = vweird.f32 %v242_v3 }
 0x31a   :  { %v206_v5 = vmul.f32 %v1395_v4, %v204_v63  ;;  %vm211_vm10 = vweird.f32 %v1395_v4 }
 0x31b   :  { %v255_v16 = vor.u32 1.1754944e-38, %v254_v11  ;;  %vm253_vm12 = vcmp.eq.f32.partialorder %v252_v13, 8.507059e+37  ;;  %vm212_vm14 = vmor %vm210_vm13, %vm211_vm10 }
 0x31c   :  { %v207_v6 = vsub.f32 1.0, %v206_v5 }
 0x31e   :  { %v208_v10 = vmul.f32 %v1395_v4, %v207_v6 }
 0x31f   :  { %v1397_v7 = vpop.eup %1396 }
 0x320   :  { %v244_v8 = vmul.f32 %v1397_v7, %v242_v3  ;;  %vm249_vm8 = vweird.f32 %v1397_v7  ;;  %v209_v15 = vadd.f32 %v1395_v4, %v208_v10 }
 0x321   :  { %vm250_vm11 = vmor %vm248_vm9, %vm249_vm8 }
 0x322   :  { %v245_v9 = vsub.f32 1.0, %v244_v8  ;;  %v213_v23 = vsel %vm212_vm14, %v1395_v4, %v209_v15  ;;  %v343_v4 = vrot.slane %v1614_v2, 4 }
 0x323   :  { %v218_v26 = vsel %vm215_vm15, %v217_v24, %v213_v23 }
 0x324   :  { %v246_v12 = vmul.f32 %v1397_v7, %v245_v9  ;;  %v220_v28 = vmul.f32 2.0, %v218_v26  ;;  %v222_v42 = vmul.f32 %v218_v26, %v1619_v22  ;;  %v1688_v22 = vld [vmem:[#allocation5 + $0x10] sm:$0xff] }
 0x325   :  { %296 = vmatpush.msra.mxu3 %v1688_v22  ;;  %441 = vmatpush.msrb.mxu1 %v1688_v22 }
 0x326   :  { %v247_v14 = vadd.f32 %v1397_v7, %v246_v12  ;;  %v1314_v29 = vadd.f32 -1.0, %v220_v28 }
 0x327   :  { %297 = vmatpush.msra.mxu3 %v1692_v52  ;;  %442 = vmatpush.msrb.mxu1 %v1692_v52 }
 0x328   :  { %v251_v18 = vsel %vm250_vm11, %v1397_v7, %v247_v14 }
 0x329   :  { %v256_v20 = vsel %vm253_vm12, %v255_v16, %v251_v18  ;;  %298 = vmatpush.msra.mxu3 %v1696_v53  ;;  %443 = vmatpush.msrb.mxu1 %v1696_v53 }
 0x32a   :  { %v258_v21 = vmul.f32 2.0, %v256_v20  ;;  %v260_v37 = vmul.f32 0.0, %v256_v20 }
 0x32b   :  { %334 = vmatpush.bf16.msrb.mxu3 %v1625_v31  ;;  %585 = vmatpush.msra.mxu1 %v1686_v51 }
 0x32c   :  { %v1316_v25 = vadd.f32 -1.0, %v258_v21 }
 0x32d   :  { %586 = vmatpush.msra.mxu1 %v1688_v22 }
 0x32e   :  { %262 = vrot.lane.b32.xlu2 %v1316_v25, %s1566_s1 }
 0x32f   :  { %335 = vmatpush.bf16.msrb.mxu3 %v1632_v35  ;;  %587 = vmatpush.msra.mxu1 %v1692_v52 }
 0x331   :  { %588 = vmatpush.msra.mxu1 %v1696_v53 }
 0x333   :  { %336 = vmatpush.bf16.msrb.mxu3 %v1639_v41 }
 0x336   :  { %224 = vrot.lane.b32.xlu2 %v1314_v29, %s1566_s1 }
 0x337   :  { %337 = vmatpush.bf16.msrb.mxu3 %v1647_v49 }
 0x388   :  { %v263_v30 = vpop.permute.xlu2 %262  ;;  %v1731_v63 = vpop.f32.mrf.mxu0 }
 0x389   :  { %v265_v32 = vmul.f32 %v263_v30, %v256_v20 }
 0x38b   :  { %267 = vrot.lane.b32.xlu0 %v265_v32, %s1566_s1 }
 0x390   :  { %v225_v33 = vpop.permute.xlu2 %224 }
 0x391   :  { %v227_v36 = vmul.f32 %v225_v33, %v218_v26 }
 0x393   :  { %229 = vrot.lane.b32.xlu1 %v227_v36, %s1566_s1 }
 0x3fd   :  { %v268_v38 = vpop.permute.xlu0 %267 }
 0x3fe   :  { %v1675_v39 = vadd.f32 %v268_v38, %v260_v37 }
 0x400   :  { %1398 = vtanh.f32 %v1675_v39 }
 0x405   :  { %v230_v43 = vpop.permute.xlu1 %229 }
 0x406   :  { %v1399_v44 = vpop.eup %1398  ;;  %v1679_v45 = vadd.f32 %v230_v43, %v222_v42 }
 0x407   :  { %273 = vrot.lane.b32.xlu2 %v1399_v44, %s1566_s1 }
 0x408   :  { %1400 = vtanh.f32 %v1679_v45 }
 0x40e   :  { %v1401_v46 = vpop.eup %1400 }
 0x40f   :  { %235 = vrot.lane.b32.xlu0 %v1401_v46, %s1566_s1 }
 0x461   :  { %v274_v48 = vpop.permute.xlu2 %273 }
 0x462   :  { %v276_v50 = vmul.f32 %v274_v48, %v256_v20 }
 0x464   :  { %309 = vrot.lane.b32.xlu0 %v276_v50, %s1568_s10  ;;  %279 = vrot.lane.b32.xlu1 %v276_v50, %s1567_s9 }
 0x481   :  { %v236_v54 = vpop.permute.xlu0 %235 }
 0x482   :  { %v238_v55 = vmul.f32 %v236_v54, %v218_v26 }
 0x484   :  { %306 = vrot.lane.b32.xlu2 %v238_v55, %s1567_s9 }
 0x4d6   :  { %v280_v58 = vpop.permute.xlu1 %279  ;;  %v310_v59 = vpop.permute.xlu0 %309 }
 0x4d7   :  { %1317 = vmatmul.msk.f32.vlgmr.msra.gmra.mxu3 %vm163_vm6, %v280_v58 }
 0x4d8   :  { %611 = vmatpush.bf16.msra.mxu3 %v1623_v27 }
 0x4dc   :  { %612 = vmatpush.bf16.msra.mxu3 %v1628_v34 }
 0x4de   :  { %v307_v60 = vpop.permute.xlu2 %306 }
 0x4df   :  { %v312_v61 = vsel %vm163_vm6, %v307_v60, %v310_v59 }
 0x4e0   :  { %v313_v62 = vpack.c.bf16 %v312_v61, %v312_v61  ;;  %613 = vmatpush.bf16.msra.mxu3 %v1635_v40 }
 0x4e2   :  { %1318 = vmatmul.msk.bf16.vlgmr.msrb.gmra.mxu0 %vm166_vm7, %v313_v62  ;;  %1319 = vmatmul.msk.bf16.vlgmr.msrb.gmra.mxu3 %vm166_vm7, %v313_v62 }
 0x4e3   :  { %754 = vmatpush.bf16.msrb.mxu0 %v1623_v27 }
 0x4e4   :  { %614 = vmatpush.bf16.msra.mxu3 %v1645_v47 }
 0x4e7   :  { %755 = vmatpush.bf16.msrb.mxu0 %v1628_v34 }
 0x4e8   :  { %767 = vmatpush.bf16.msrb.mxu3 %v1625_v31 }
 0x4eb   :  { %756 = vmatpush.bf16.msrb.mxu0 %v1635_v40 }
 0x4ec   :  { %768 = vmatpush.bf16.msrb.mxu3 %v1632_v35 }
 0x4ef   :  { %757 = vmatpush.bf16.msrb.mxu0 %v1645_v47 }
 0x4f0   :  { %769 = vmatpush.bf16.msrb.mxu3 %v1639_v41 }
 0x4f4   :  { %770 = vmatpush.bf16.msrb.mxu3 %v1647_v49 }
 0x55a   :  { %v300_v1 = vpop.f32.mrf.mxu3 }
 0x55b   :  { %v301_v3 = vadd.f32 %v1733_v0, %v300_v1 }
 0x55d   :  { %304 = vst.msk [vmem:[%s1983_s4] sm:$0x3] %vm303_vm0, %v301_v3 }
 0x55f   :  { %v326_v5 = vpop.f32.mrf.mxu0 }
 0x560   :  { %v345_v6 = vadd.f32 %v343_v4, %v326_v5 }
 0x562   :  { %v1320_v7 = vmul.f32 -1.442695, %v345_v6 }
 0x564   :  { %1402 = vpow2.f32 %v1320_v7 }
 0x565   :  { %v339_v8 = vpop.f32.mrf.mxu3 }
 0x566   :  { %v346_v9 = vadd.f32 %v1668_v57, %v339_v8 }
 0x567   :  { %v328_v10 = vpop.f32.mrf.mxu0 }
 0x568   :  { %v1322_v11 = vmul.f32 -1.442695, %v346_v9 }
 0x56a   :  { %v1403_v12 = vpop.eup %1402  ;;  %1404 = vpow2.f32 %v1322_v11 }
 0x56b   :  { %v350_v13 = vadd.f32 1.0, %v1403_v12 }
 0x56d   :  { %1406 = vrcp.f32 %v350_v13  ;;  %v341_v14 = vpop.f32.mrf.mxu3  ;;  %v362_v20 = vand.u32 2147483648, %v350_v13  ;;  %v360_v23 = vand.u32 2147483647, %v350_v13  ;;  %vm356_vm2 = vweird.f32 %v350_v13 }
 0x56f   :  { %v363_v28 = vor.u32 1.1754944e-38, %v362_v20  ;;  %vm361_vm4 = vcmp.eq.f32.partialorder %v360_v23, 8.507059e+37 }
 0x570   :  { %v1405_v15 = vpop.eup %1404 }
 0x571   :  { %v388_v16 = vadd.f32 1.0, %v1405_v15 }
 0x573   :  { %v1407_v17 = vpop.eup %1406  ;;  %1408 = vrcp.f32 %v388_v16  ;;  %v400_v33 = vand.u32 2147483648, %v388_v16  ;;  %v398_v38 = vand.u32 2147483647, %v388_v16  ;;  %vm394_vm8 = vweird.f32 %v388_v16 }
 0x574   :  { %v352_v18 = vmul.f32 %v1407_v17, %v350_v13  ;;  %vm357_vm1 = vweird.f32 %v1407_v17 }
 0x575   :  { %vm358_vm3 = vmor %vm356_vm2, %vm357_vm1  ;;  %v401_v44 = vor.u32 1.1754944e-38, %v400_v33  ;;  %vm399_vm10 = vcmp.eq.f32.partialorder %v398_v38, 8.507059e+37 }
 0x576   :  { %v353_v19 = vsub.f32 1.0, %v352_v18 }
 0x578   :  { %v354_v21 = vmul.f32 %v1407_v17, %v353_v19 }
 0x579   :  { %v1409_v24 = vpop.eup %1408 }
 0x57a   :  { %v390_v25 = vmul.f32 %v1409_v24, %v388_v16  ;;  %v355_v26 = vadd.f32 %v1407_v17, %v354_v21  ;;  %vm395_vm5 = vweird.f32 %v1409_v24  ;;  %v488_v16 = vrot.slane %v1614_v2, 6 }
 0x57b   :  { %vm396_vm9 = vmor %vm394_vm8, %vm395_vm5 }
 0x57c   :  { %v391_v29 = vsub.f32 1.0, %v390_v25  ;;  %v359_v30 = vsel %vm358_vm3, %v1407_v17, %v355_v26 }
 0x57d   :  { %v364_v32 = vsel %vm361_vm4, %v363_v28, %v359_v30 }
 0x57e   :  { %v366_v36 = vmul.f32 2.0, %v364_v32  ;;  %v392_v37 = vmul.f32 %v1409_v24, %v391_v29  ;;  %v368_v3 = vmul.f32 %v364_v32, %v1679_v45 }
 0x580   :  { %v1321_v42 = vadd.f32 -1.0, %v366_v36  ;;  %v393_v43 = vadd.f32 %v1409_v24, %v392_v37 }
 0x582   :  { %370 = vrot.lane.b32.xlu1 %v1321_v42, %s1566_s1  ;;  %v397_v46 = vsel %vm396_vm9, %v1409_v24, %v393_v43 }
 0x583   :  { %v402_v48 = vsel %vm399_vm10, %v401_v44, %v397_v46 }
 0x584   :  { %v404_v50 = vmul.f32 2.0, %v402_v48  ;;  %v406_v60 = vmul.f32 %v402_v48, %v1675_v39 }
 0x586   :  { %v1323_v54 = vadd.f32 -1.0, %v404_v50 }
 0x588   :  { %408 = vrot.lane.b32.xlu2 %v1323_v54, %s1566_s1 }
 0x5e2   :  { %v409_v55 = vpop.permute.xlu2 %408 }
 0x5e3   :  { %v411_v56 = vmul.f32 %v409_v55, %v402_v48 }
 0x5e5   :  { %413 = vrot.lane.b32.xlu1 %v411_v56, %s1566_s1 }
 0x5f4   :  { %v371_v58 = vpop.permute.xlu1 %370 }
 0x5f5   :  { %v373_v59 = vmul.f32 %v371_v58, %v364_v32 }
 0x5f7   :  { %375 = vrot.lane.b32.xlu0 %v373_v59, %s1566_s1 }
 0x657   :  { %v414_v61 = vpop.permute.xlu1 %413 }
 0x658   :  { %v1747_v62 = vadd.f32 %v414_v61, %v406_v60 }
 0x65a   :  { %1410 = vtanh.f32 %v1747_v62 }
 0x660   :  { %v1411_v1 = vpop.eup %1410 }
 0x661   :  { %419 = vrot.lane.b32.xlu0 %v1411_v1, %s1566_s1 }
 0x669   :  { %v376_v4 = vpop.permute.xlu0 %375 }
 0x66a   :  { %v1752_v5 = vadd.f32 %v376_v4, %v368_v3 }
 0x66c   :  { %1412 = vtanh.f32 %v1752_v5 }
 0x672   :  { %v1413_v6 = vpop.eup %1412 }
 0x673   :  { %381 = vrot.lane.b32.xlu2 %v1413_v6, %s1566_s1 }
 0x6cd   :  { %v382_v7 = vpop.permute.xlu2 %381 }
 0x6ce   :  { %v384_v39 = vmul.f32 %v382_v7, %v364_v32 }
 0x6d0   :  { %451 = vrot.lane.b32.xlu1 %v384_v39, %s1567_s9 }
 0x6d3   :  { %v420_v8 = vpop.permute.xlu0 %419 }
 0x6d4   :  { %v1757_v9 = vmul.f32 %v420_v8, %v402_v48 }
 0x6d6   :  { %454 = vrot.lane.b32.xlu2 %v1757_v9, %s1568_s10 }
 0x730   :  { %v455_v10 = vpop.permute.xlu2 %454 }
 0x742   :  { %v452_v45 = vpop.permute.xlu1 %451 }
 0x743   :  { %v457_v11 = vsel %vm163_vm6, %v452_v45, %v455_v10 }
 0x744   :  { %v458_v12 = vpack.c.bf16 %v457_v11, %v457_v11 }
 0x746   :  { %1326 = vmatmul.msk.bf16.vlgmr.msrb.gmra.mxu2 %vm166_vm7, %v458_v12  ;;  %1327 = vmatmul.msk.bf16.vlgmr.msra.gmra.mxu0 %vm166_vm7, %v458_v12 }
 0x747   :  { %900 = vmatpush.bf16.msrb.mxu2 %v1623_v27  ;;  %913 = vmatpush.bf16.msra.mxu0 %v1625_v31 }
 0x74b   :  { %901 = vmatpush.bf16.msrb.mxu2 %v1628_v34  ;;  %914 = vmatpush.bf16.msra.mxu0 %v1632_v35 }
 0x74f   :  { %902 = vmatpush.bf16.msrb.mxu2 %v1635_v40  ;;  %915 = vmatpush.bf16.msra.mxu0 %v1639_v41 }
 0x753   :  { %903 = vmatpush.bf16.msrb.mxu2 %v1645_v47  ;;  %916 = vmatpush.bf16.msra.mxu0 %v1647_v49 }
 0x7c3   :  { %v484_v13 = vpop.f32.mrf.mxu0 }
 0x7c4   :  { %v491_v14 = vadd.f32 %v1668_v57, %v484_v13 }
 0x7c6   :  { %v1330_v15 = vmul.f32 -1.442695, %v491_v14 }
 0x7c8   :  { %1414 = vpow2.f32 %v1330_v15 }
 0x7c9   :  { %v471_v17 = vpop.f32.mrf.mxu2 }
 0x7ca   :  { %v490_v18 = vadd.f32 %v488_v16, %v471_v17 }
 0x7cb   :  { %v486_v19 = vpop.f32.mrf.mxu0 }
 0x7cc   :  { %v1328_v20 = vmul.f32 -1.442695, %v490_v18 }
 0x7ce   :  { %v1415_v21 = vpop.eup %1414  ;;  %1416 = vpow2.f32 %v1328_v20 }
 0x7cf   :  { %v533_v23 = vadd.f32 1.0, %v1415_v21 }
 0x7d1   :  { %1418 = vrcp.f32 %v533_v23  ;;  %v473_v24 = vpop.f32.mrf.mxu2  ;;  %v545_v32 = vand.u32 2147483648, %v533_v23  ;;  %v543_v36 = vand.u32 2147483647, %v533_v23  ;;  %vm539_vm12 = vweird.f32 %v533_v23 }
 0x7d3   :  { %v546_v42 = vor.u32 1.1754944e-38, %v545_v32  ;;  %vm544_vm14 = vcmp.eq.f32.partialorder %v543_v36, 8.507059e+37 }
 0x7d4   :  { %v1417_v25 = vpop.eup %1416 }
 0x7d5   :  { %v495_v26 = vadd.f32 1.0, %v1417_v25 }
 0x7d7   :  { %v1419_v28 = vpop.eup %1418  ;;  %1420 = vrcp.f32 %v495_v26  ;;  %v507_v48 = vand.u32 2147483648, %v495_v26  ;;  %v505_v55 = vand.u32 2147483647, %v495_v26  ;;  %vm501_vm1 = vweird.f32 %v495_v26 }
 0x7d8   :  { %v535_v29 = vmul.f32 %v1419_v28, %v533_v23  ;;  %vm540_vm11 = vweird.f32 %v1419_v28 }
 0x7d9   :  { %vm541_vm13 = vmor %vm539_vm12, %vm540_vm11  ;;  %v508_v59 = vor.u32 1.1754944e-38, %v507_v48  ;;  %vm506_vm3 = vcmp.eq.f32.partialorder %v505_v55, 8.507059e+37 }
 0x7da   :  { %v536_v30 = vsub.f32 1.0, %v535_v29 }
 0x7dc   :  { %v537_v33 = vmul.f32 %v1419_v28, %v536_v30 }
 0x7dd   :  { %v1421_v2 = vpop.eup %1420 }
 0x7de   :  { %v497_v37 = vmul.f32 %v1421_v2, %v495_v26  ;;  %v538_v38 = vadd.f32 %v1419_v28, %v537_v33  ;;  %vm502_vm15 = vweird.f32 %v1421_v2 }
 0x7df   :  { %vm503_vm2 = vmor %vm501_vm1, %vm502_vm15 }
 0x7e0   :  { %v498_v43 = vsub.f32 1.0, %v497_v37  ;;  %v542_v44 = vsel %vm541_vm13, %v1419_v28, %v538_v38 }
 0x7e1   :  { %v547_v46 = vsel %vm544_vm14, %v546_v42, %v542_v44 }
 0x7e2   :  { %v549_v50 = vmul.f32 2.0, %v547_v46  ;;  %v499_v54 = vmul.f32 %v1421_v2, %v498_v43  ;;  %v551_v12 = vmul.f32 %v547_v46, %v1747_v62 }
 0x7e4   :  { %v1331_v56 = vadd.f32 -1.0, %v549_v50  ;;  %v500_v58 = vadd.f32 %v1421_v2, %v499_v54 }
 0x7e6   :  { %553 = vrot.lane.b32.xlu1 %v1331_v56, %s1566_s1  ;;  %v504_v60 = vsel %vm503_vm2, %v1421_v2, %v500_v58 }
 0x7e7   :  { %v509_v61 = vsel %vm506_vm3, %v508_v59, %v504_v60 }
 0x7e8   :  { %v511_v1 = vmul.f32 2.0, %v509_v61  ;;  %v513_v8 = vmul.f32 %v509_v61, %v1752_v5 }
 0x7ea   :  { %v1329_v3 = vadd.f32 -1.0, %v511_v1 }
 0x7ec   :  { %515 = vrot.lane.b32.xlu0 %v1329_v3, %s1566_s1 }
 0x858   :  { %v554_v4 = vpop.permute.xlu1 %553 }
 0x859   :  { %v556_v6 = vmul.f32 %v554_v4, %v547_v46 }
 0x85b   :  { %558 = vrot.lane.b32.xlu0 %v556_v6, %s1566_s1 }
 0x85e   :  { %v516_v7 = vpop.permute.xlu0 %515 }
 0x85f   :  { %v518_v39 = vmul.f32 %v516_v7, %v509_v61 }
 0x861   :  { %520 = vrot.lane.b32.xlu2 %v518_v39, %s1566_s1 }
 0x8bb   :  { %v521_v10 = vpop.permute.xlu2 %520 }
 0x8bc   :  { %v1779_v45 = vadd.f32 %v521_v10, %v513_v8 }
 0x8be   :  { %1422 = vtanh.f32 %v1779_v45 }
 0x8c4   :  { %v1423_v11 = vpop.eup %1422 }
 0x8c5   :  { %526 = vrot.lane.b32.xlu1 %v1423_v11, %s1566_s1 }
 0x8cd   :  { %v559_v13 = vpop.permute.xlu0 %558 }
 0x8ce   :  { %v1784_v14 = vadd.f32 %v559_v13, %v551_v12 }
 0x8d0   :  { %1424 = vtanh.f32 %v1784_v14 }
 0x8d6   :  { %v1425_v15 = vpop.eup %1424 }
 0x8d7   :  { %564 = vrot.lane.b32.xlu2 %v1425_v15, %s1566_s1 }
 0x931   :  { %v565_v16 = vpop.permute.xlu2 %564 }
 0x932   :  { %v1788_v5 = vmul.f32 %v565_v16, %v547_v46 }
 0x934   :  { %599 = vrot.lane.b32.xlu1 %v1788_v5, %s1568_s10 }
 0x937   :  { %v527_v17 = vpop.permute.xlu1 %526 }
 0x938   :  { %v529_v18 = vmul.f32 %v527_v17, %v509_v61 }
 0x93a   :  { %596 = vrot.lane.b32.xlu0 %v529_v18, %s1567_s9 }
 0x9a6   :  { %v600_v19 = vpop.permute.xlu1 %599 }
 0x9ac   :  { %v597_v62 = vpop.permute.xlu0 %596 }
 0x9ad   :  { %v602_v20 = vsel %vm163_vm6, %v597_v62, %v600_v19 }
 0x9ae   :  { %v603_v21 = vpack.c.bf16 %v602_v20, %v602_v20 }
 0x9b0   :  { %1334 = vmatmul.msk.bf16.vlgmr.msra.gmra.mxu3 %vm166_vm7, %v603_v21  ;;  %1335 = vmatmul.msk.bf16.vlgmr.msra.gmra.mxu2 %vm166_vm7, %v603_v21 }
 0x9b1   :  { %1045 = vmatpush.bf16.msra.mxu3 %v1623_v27  ;;  %1164 = vmatpush.msra.mxu2 %v1686_v51 }
 0x9b3   :  { %1165 = vmatpush.msra.mxu2 %v1688_v22 }
 0x9b5   :  { %1046 = vmatpush.bf16.msra.mxu3 %v1628_v34  ;;  %1166 = vmatpush.msra.mxu2 %v1692_v52 }
 0x9b7   :  { %1167 = vmatpush.msra.mxu2 %v1696_v53 }
 0x9b9   :  { %1047 = vmatpush.bf16.msra.mxu3 %v1635_v40 }
 0x9bd   :  { %1048 = vmatpush.bf16.msra.mxu3 %v1645_v47 }
 0xa33   :  { %v616_v23 = vpop.f32.mrf.mxu3  ;;  %v629_v24 = vpop.f32.mrf.mxu2 }
 0xa34   :  { %v633_v25 = vadd.f32 %v616_v23, %v1731_v63  ;;  %v634_v27 = vadd.f32 %v1668_v57, %v629_v24 }
 0xa36   :  { %v1336_v26 = vmul.f32 -1.442695, %v633_v25  ;;  %v1338_v28 = vmul.f32 -1.442695, %v634_v27 }
 0xa38   :  { %1426 = vpow2.f32 %v1336_v26 }
 0xa39   :  { %1428 = vpow2.f32 %v1338_v28  ;;  %v777_v28 = vrot.slane %v1731_v63, 2 }
 0xa3b   :  { %v618_v29 = vpop.f32.mrf.mxu3  ;;  %v631_v34 = vpop.f32.mrf.mxu2 }
 0xa3e   :  { %v1427_v30 = vpop.eup %1426 }
 0xa3f   :  { %v1429_v32 = vpop.eup %1428  ;;  %v638_v33 = vadd.f32 1.0, %v1427_v30 }
 0xa40   :  { %v676_v36 = vadd.f32 1.0, %v1429_v32 }
 0xa41   :  { %1430 = vrcp.f32 %v638_v33  ;;  %v650_v43 = vand.u32 2147483648, %v638_v33  ;;  %v648_v48 = vand.u32 2147483647, %v638_v33  ;;  %vm644_vm8 = vweird.f32 %v638_v33 }
 0xa42   :  { %1432 = vrcp.f32 %v676_v36  ;;  %v688_v44 = vand.u32 2147483648, %v676_v36  ;;  %v686_v54 = vand.u32 2147483647, %v676_v36  ;;  %vm682_vm9 = vweird.f32 %v676_v36 }
 0xa43   :  { %v651_v58 = vor.u32 1.1754944e-38, %v650_v43  ;;  %vm649_vm12 = vcmp.eq.f32.partialorder %v648_v48, 8.507059e+37 }
 0xa44   :  { %v689_v59 = vor.u32 1.1754944e-38, %v688_v44  ;;  %vm687_vm13 = vcmp.eq.f32.partialorder %v686_v54, 8.507059e+37 }
 0xa47   :  { %v1431_v40 = vpop.eup %1430 }
 0xa48   :  { %v1433_v47 = vpop.eup %1432  ;;  %v640_v2 = vmul.f32 %v1431_v40, %v638_v33  ;;  %vm645_vm4 = vweird.f32 %v1431_v40 }
 0xa49   :  { %v678_v37 = vmul.f32 %v1433_v47, %v676_v36  ;;  %vm683_vm5 = vweird.f32 %v1433_v47  ;;  %vm646_vm10 = vmor %vm644_vm8, %vm645_vm4 }
 0xa4a   :  { %v641_v38 = vsub.f32 1.0, %v640_v2  ;;  %vm684_vm11 = vmor %vm682_vm9, %vm683_vm5 }
 0xa4b   :  { %v679_v42 = vsub.f32 1.0, %v678_v37 }
 0xa4c   :  { %v642_v46 = vmul.f32 %v1431_v40, %v641_v38 }
 0xa4d   :  { %v680_v50 = vmul.f32 %v1433_v47, %v679_v42 }
 0xa4e   :  { %v643_v55 = vadd.f32 %v1431_v40, %v642_v46 }
 0xa4f   :  { %v681_v56 = vadd.f32 %v1433_v47, %v680_v50 }
 0xa50   :  { %v647_v60 = vsel %vm646_vm10, %v1431_v40, %v643_v55 }
 0xa51   :  { %v685_v61 = vsel %vm684_vm11, %v1433_v47, %v681_v56  ;;  %v652_v1 = vsel %vm649_vm12, %v651_v58, %v647_v60 }
 0xa52   :  { %v690_v3 = vsel %vm687_vm13, %v689_v59, %v685_v61  ;;  %v654_v4 = vmul.f32 2.0, %v652_v1  ;;  %v656_v13 = vmul.f32 %v652_v1, %v1779_v45 }
 0xa53   :  { %v692_v6 = vmul.f32 2.0, %v690_v3  ;;  %v694_v16 = vmul.f32 %v690_v3, %v1784_v14 }
 0xa54   :  { %v1337_v7 = vadd.f32 -1.0, %v654_v4 }
 0xa55   :  { %v1339_v39 = vadd.f32 -1.0, %v692_v6 }
 0xa56   :  { %658 = vrot.lane.b32.xlu2 %v1337_v7, %s1566_s1 }
 0xa57   :  { %696 = vrot.lane.b32.xlu0 %v1339_v39, %s1566_s1 }
 0xab0   :  { %v659_v8 = vpop.permute.xlu2 %658 }
 0xab1   :  { %v661_v10 = vmul.f32 %v659_v8, %v652_v1 }
 0xab3   :  { %663 = vrot.lane.b32.xlu1 %v661_v10, %s1566_s1 }
 0xac9   :  { %v697_v11 = vpop.permute.xlu0 %696 }
 0xaca   :  { %v699_v12 = vmul.f32 %v697_v11, %v690_v3 }
 0xacc   :  { %701 = vrot.lane.b32.xlu2 %v699_v12, %s1566_s1 }
 0xb25   :  { %v664_v15 = vpop.permute.xlu1 %663 }
 0xb26   :  { %v1812_v17 = vadd.f32 %v664_v15, %v656_v13  ;;  %v702_v18 = vpop.permute.xlu2 %701 }
 0xb27   :  { %v1814_v19 = vadd.f32 %v702_v18, %v694_v16 }
 0xb28   :  { %1434 = vtanh.f32 %v1812_v17 }
 0xb29   :  { %1436 = vtanh.f32 %v1814_v19 }
 0xb2e   :  { %v1435_v62 = vpop.eup %1434 }
 0xb2f   :  { %v1437_v20 = vpop.eup %1436  ;;  %669 = vrot.lane.b32.xlu0 %v1435_v62, %s1566_s1 }
 0xb30   :  { %707 = vrot.lane.b32.xlu1 %v1437_v20, %s1566_s1 }
 0xba1   :  { %v670_v21 = vpop.permute.xlu0 %669 }
 0xba2   :  { %v672_v45 = vmul.f32 %v670_v21, %v652_v1  ;;  %v708_v23 = vpop.permute.xlu1 %707 }
 0xba3   :  { %v1820_v24 = vmul.f32 %v708_v23, %v690_v3 }
 0xba4   :  { %739 = vrot.lane.b32.xlu2 %v672_v45, %s1567_s9 }
 0xba5   :  { %742 = vrot.lane.b32.xlu0 %v1820_v24, %s1568_s10 }
 0xbfe   :  { %v740_v14 = vpop.permute.xlu2 %739 }
 0xc17   :  { %v743_v25 = vpop.permute.xlu0 %742 }
 0xc18   :  { %v745_v27 = vsel %vm163_vm6, %v740_v14, %v743_v25 }
 0xc19   :  { %v746_v26 = vpack.c.bf16 %v745_v27, %v745_v27 }
 0xc1b   :  { %1342 = vmatmul.msk.bf16.vlgmr.msrb.gmra.mxu0 %vm166_vm7, %v746_v26  ;;  %1343 = vmatmul.msk.bf16.vlgmr.msrb.gmra.mxu3 %vm166_vm7, %v746_v26 }
 0xc1c   :  { %1190 = vmatpush.bf16.msrb.mxu0 %v1625_v31 }
 0xc20   :  { %1191 = vmatpush.bf16.msrb.mxu0 %v1632_v35 }
 0xc24   :  { %1192 = vmatpush.bf16.msrb.mxu0 %v1639_v41 }
 0xc28   :  { %1193 = vmatpush.bf16.msrb.mxu0 %v1647_v49 }
 0xc98   :  { %v759_v29 = vpop.f32.mrf.mxu0 }
 0xc99   :  { %v779_v34 = vadd.f32 %v777_v28, %v759_v29 }
 0xc9b   :  { %v1344_v30 = vmul.f32 -1.442695, %v779_v34 }
 0xc9d   :  { %1438 = vpow2.f32 %v1344_v30 }
 0xc9e   :  { %v772_v32 = vpop.f32.mrf.mxu3 }
 0xc9f   :  { %v780_v33 = vadd.f32 %v1668_v57, %v772_v32 }
 0xca0   :  { %v761_v36 = vpop.f32.mrf.mxu0 }
 0xca1   :  { %v1346_v40 = vmul.f32 -1.442695, %v780_v33 }
 0xca3   :  { %v1439_v47 = vpop.eup %1438  ;;  %1440 = vpow2.f32 %v1346_v40 }
 0xca4   :  { %v784_v2 = vadd.f32 1.0, %v1439_v47 }
 0xca6   :  { %1442 = vrcp.f32 %v784_v2  ;;  %v774_v37 = vpop.f32.mrf.mxu3  ;;  %v796_v48 = vand.u32 2147483648, %v784_v2  ;;  %v794_v54 = vand.u32 2147483647, %v784_v2  ;;  %vm790_vm15 = vweird.f32 %v784_v2 }
 0xca7   :  { %v922_v37 = vrot.slane %v1731_v63, 4 }
 0xca8   :  { %v797_v59 = vor.u32 1.1754944e-38, %v796_v48  ;;  %vm795_vm2 = vcmp.eq.f32.partialorder %v794_v54, 8.507059e+37 }
 0xca9   :  { %v1441_v38 = vpop.eup %1440 }
 0xcaa   :  { %v822_v42 = vadd.f32 1.0, %v1441_v38 }
 0xcac   :  { %v1443_v43 = vpop.eup %1442  ;;  %1444 = vrcp.f32 %v822_v42  ;;  %v834_v3 = vand.u32 2147483648, %v822_v42  ;;  %v832_v7 = vand.u32 2147483647, %v822_v42  ;;  %vm828_vm4 = vweird.f32 %v822_v42 }
 0xcad   :  { %v786_v44 = vmul.f32 %v1443_v43, %v784_v2  ;;  %vm791_vm14 = vweird.f32 %v1443_v43 }
 0xcae   :  { %vm792_vm1 = vmor %vm790_vm15, %vm791_vm14  ;;  %v835_v10 = vor.u32 1.1754944e-38, %v834_v3  ;;  %vm833_vm8 = vcmp.eq.f32.partialorder %v832_v7, 8.507059e+37 }
 0xcaf   :  { %v787_v46 = vsub.f32 1.0, %v786_v44 }
 0xcb1   :  { %v788_v50 = vmul.f32 %v1443_v43, %v787_v46 }
 0xcb2   :  { %v1445_v55 = vpop.eup %1444 }
 0xcb3   :  { %v824_v56 = vmul.f32 %v1445_v55, %v822_v42  ;;  %v789_v58 = vadd.f32 %v1443_v43, %v788_v50  ;;  %vm829_vm3 = vweird.f32 %v1445_v55 }
 0xcb4   :  { %vm830_vm5 = vmor %vm828_vm4, %vm829_vm3 }
 0xcb5   :  { %v825_v60 = vsub.f32 1.0, %v824_v56  ;;  %v793_v61 = vsel %vm792_vm1, %v1443_v43, %v789_v58 }
 0xcb6   :  { %v798_v1 = vsel %vm795_vm2, %v797_v59, %v793_v61 }
 0xcb7   :  { %v800_v4 = vmul.f32 2.0, %v798_v1  ;;  %v826_v6 = vmul.f32 %v1445_v55, %v825_v60  ;;  %v802_v25 = vmul.f32 %v798_v1, %v1812_v17 }
 0xcb9   :  { %v1345_v39 = vadd.f32 -1.0, %v800_v4  ;;  %v827_v8 = vadd.f32 %v1445_v55, %v826_v6 }
 0xcbb   :  { %804 = vrot.lane.b32.xlu1 %v1345_v39, %s1566_s1  ;;  %v831_v11 = vsel %vm830_vm5, %v1445_v55, %v827_v8 }
 0xcbc   :  { %v836_v12 = vsel %vm833_vm8, %v835_v10, %v831_v11 }
 0xcbd   :  { %v838_v13 = vmul.f32 2.0, %v836_v12  ;;  %v840_v21 = vmul.f32 %v836_v12, %v1814_v19 }
 0xcbf   :  { %v1347_v15 = vadd.f32 -1.0, %v838_v13 }
 0xcc1   :  { %842 = vrot.lane.b32.xlu2 %v1347_v15, %s1566_s1 }
 0xd1b   :  { %v843_v16 = vpop.permute.xlu2 %842 }
 0xd1c   :  { %v845_v18 = vmul.f32 %v843_v16, %v836_v12 }
 0xd1e   :  { %847 = vrot.lane.b32.xlu1 %v845_v18, %s1566_s1 }
 0xd2d   :  { %v805_v62 = vpop.permute.xlu1 %804 }
 0xd2e   :  { %v807_v20 = vmul.f32 %v805_v62, %v798_v1 }
 0xd30   :  { %809 = vrot.lane.b32.xlu0 %v807_v20, %s1566_s1 }
 0xd90   :  { %v848_v45 = vpop.permute.xlu1 %847 }
 0xd91   :  { %v1839_v23 = vadd.f32 %v848_v45, %v840_v21 }
 0xd93   :  { %1446 = vtanh.f32 %v1839_v23 }
 0xd99   :  { %v1447_v14 = vpop.eup %1446 }
 0xd9a   :  { %853 = vrot.lane.b32.xlu0 %v1447_v14, %s1566_s1 }
 0xda2   :  { %v810_v27 = vpop.permute.xlu0 %809 }
 0xda3   :  { %v1844_v26 = vadd.f32 %v810_v27, %v802_v25 }
 0xda5   :  { %1448 = vtanh.f32 %v1844_v26 }
 0xdab   :  { %v1449_v28 = vpop.eup %1448 }
 0xdac   :  { %815 = vrot.lane.b32.xlu2 %v1449_v28, %s1566_s1 }
 0xe06   :  { %v816_v29 = vpop.permute.xlu2 %815 }
 0xe07   :  { %v818_v19 = vmul.f32 %v816_v29, %v798_v1 }
 0xe09   :  { %885 = vrot.lane.b32.xlu1 %v818_v19, %s1567_s9 }
 0xe0c   :  { %v854_v34 = vpop.permute.xlu0 %853 }
 0xe0d   :  { %v1849_v30 = vmul.f32 %v854_v34, %v836_v12 }
 0xe0f   :  { %888 = vrot.lane.b32.xlu2 %v1849_v30, %s1568_s10 }
 0xe69   :  { %v889_v32 = vpop.permute.xlu2 %888 }
 0xe7b   :  { %v886_v17 = vpop.permute.xlu1 %885 }
 0xe7c   :  { %v891_v33 = vsel %vm163_vm6, %v886_v17, %v889_v32 }
 0xe7d   :  { %v892_v36 = vpack.c.bf16 %v891_v33, %v891_v33 }
 0xe7f   :  { %1350 = vmatmul.msk.bf16.vlgmr.msrb.gmra.mxu2 %vm166_vm7, %v892_v36  ;;  %1351 = vmatmul.msk.bf16.vlgmr.msra.gmra.mxu0 %vm166_vm7, %v892_v36 }
 0xe80   :  { %1255 = vmatpush.msrb.mxu2 %v1686_v51 }
 0xe82   :  { %1256 = vmatpush.msrb.mxu2 %v1688_v22 }
 0xe84   :  { %1257 = vmatpush.msrb.mxu2 %v1692_v52 }
 0xe86   :  { %1258 = vmatpush.msrb.mxu2 %v1696_v53 }
 0xefc   :  { %v918_v40 = vpop.f32.mrf.mxu0 }
 0xefd   :  { %v925_v47 = vadd.f32 %v1668_v57, %v918_v40 }
 0xeff   :  { %v1354_v2 = vmul.f32 -1.442695, %v925_v47 }
 0xf01   :  { %1450 = vpow2.f32 %v1354_v2 }
 0xf02   :  { %v905_v38 = vpop.f32.mrf.mxu2 }
 0xf03   :  { %v924_v42 = vadd.f32 %v922_v37, %v905_v38 }
 0xf04   :  { %v920_v43 = vpop.f32.mrf.mxu0 }
 0xf05   :  { %v1352_v44 = vmul.f32 -1.442695, %v924_v42 }
 0xf07   :  { %v1451_v46 = vpop.eup %1450  ;;  %1452 = vpow2.f32 %v1352_v44 }
 0xf08   :  { %v967_v48 = vadd.f32 1.0, %v1451_v46 }
 0xf0a   :  { %1454 = vrcp.f32 %v967_v48  ;;  %v907_v50 = vpop.f32.mrf.mxu2  ;;  %v979_v57 = vand.u32 2147483648, %v967_v48  ;;  %v977_v61 = vand.u32 2147483647, %v967_v48  ;;  %vm973_vm10 = vweird.f32 %v967_v48 }
 0xf0c   :  { %v980_v6 = vor.u32 1.1754944e-38, %v979_v57  ;;  %vm978_vm12 = vcmp.eq.f32.partialorder %v977_v61, 8.507059e+37 }
 0xf0d   :  { %v1453_v54 = vpop.eup %1452 }
 0xf0e   :  { %v929_v55 = vadd.f32 1.0, %v1453_v54  ;;  %v1936_v54 = vld [vmem:[#allocation5 + $0x20] ss:$0 sm:$0xff] }
 0xf10   :  { %v1455_v56 = vpop.eup %1454  ;;  %1456 = vrcp.f32 %v929_v55  ;;  %v941_v10 = vand.u32 2147483648, %v929_v55  ;;  %v939_v13 = vand.u32 2147483647, %v929_v55  ;;  %vm935_vm14 = vweird.f32 %v929_v55 }
 0xf11   :  { %v969_v58 = vmul.f32 %v1455_v56, %v967_v48  ;;  %vm974_vm9 = vweird.f32 %v1455_v56 }
 0xf12   :  { %vm975_vm11 = vmor %vm973_vm10, %vm974_vm9  ;;  %v942_v18 = vor.u32 1.1754944e-38, %v941_v10  ;;  %vm940_vm1 = vcmp.eq.f32.partialorder %v939_v13, 8.507059e+37 }
 0xf13   :  { %v970_v59 = vsub.f32 1.0, %v969_v58  ;;  %v1067_v58 = vrot.slane %v1731_v63, 6 }
 0xf15   :  { %v971_v60 = vmul.f32 %v1455_v56, %v970_v59 }
 0xf16   :  { %v1457_v1 = vpop.eup %1456 }
 0xf17   :  { %v931_v3 = vmul.f32 %v1457_v1, %v929_v55  ;;  %v972_v4 = vadd.f32 %v1455_v56, %v971_v60  ;;  %vm936_vm13 = vweird.f32 %v1457_v1 }
 0xf18   :  { %vm937_vm15 = vmor %vm935_vm14, %vm936_vm13 }
 0xf19   :  { %v932_v7 = vsub.f32 1.0, %v931_v3  ;;  %v976_v39 = vsel %vm975_vm11, %v1455_v56, %v972_v4 }
 0xf1a   :  { %v981_v8 = vsel %vm978_vm12, %v980_v6, %v976_v39  ;;  %vm1265_vm12 = vcmask 254976  }
 0xf1b   :  { %v983_v11 = vmul.f32 2.0, %v981_v8  ;;  %v933_v12 = vmul.f32 %v1457_v1, %v932_v7  ;;  %v985_v17 = vmul.f32 %v981_v8, %v1839_v23 }
 0xf1d   :  { %v1355_v15 = vadd.f32 -1.0, %v983_v11  ;;  %v934_v16 = vadd.f32 %v1457_v1, %v933_v12 }
 0xf1f   :  { %987 = vrot.lane.b32.xlu1 %v1355_v15, %s1566_s1  ;;  %v938_v62 = vsel %vm937_vm15, %v1457_v1, %v934_v16 }
 0xf20   :  { %v943_v20 = vsel %vm940_vm1, %v942_v18, %v938_v62 }
 0xf21   :  { %v945_v21 = vmul.f32 2.0, %v943_v20  ;;  %v947_v29 = vmul.f32 %v943_v20, %v1844_v26 }
 0xf23   :  { %v1353_v45 = vadd.f32 -1.0, %v945_v21 }
 0xf25   :  { %949 = vrot.lane.b32.xlu0 %v1353_v45, %s1566_s1 }
 0xf91   :  { %v988_v14 = vpop.permute.xlu1 %987 }
 0xf92   :  { %v990_v25 = vmul.f32 %v988_v14, %v981_v8 }
 0xf94   :  { %992 = vrot.lane.b32.xlu0 %v990_v25, %s1566_s1 }
 0xf97   :  { %v950_v27 = vpop.permute.xlu0 %949 }
 0xf98   :  { %v952_v28 = vmul.f32 %v950_v27, %v943_v20 }
 0xf9a   :  { %954 = vrot.lane.b32.xlu2 %v952_v28, %s1566_s1 }
 0xf9c   :  { %424 = vrot.lane.b32.xlu0 %v1757_v9, %s1567_s9 }
 0xfa4   :  { %858 = vrot.lane.b32.xlu0 %v1849_v30, %s1567_s9 }
 0xff4   :  { %v955_v19 = vpop.permute.xlu2 %954 }
 0xff5   :  { %v1871_v34 = vadd.f32 %v955_v19, %v947_v29 }
 0xff7   :  { %1458 = vtanh.f32 %v1871_v34 }
 0xffd   :  { %v1459_v32 = vpop.eup %1458 }
 0xffe   :  { %960 = vrot.lane.b32.xlu1 %v1459_v32, %s1566_s1 }
0x1006   :  { %569 = vrot.lane.b32.xlu1 %v1788_v5, %s1567_s9  ;;  %v993_v33 = vpop.permute.xlu0 %992 }
0x1007   :  { %v1878_v9 = vadd.f32 %v993_v33, %v985_v17 }
0x1009   :  { %1460 = vtanh.f32 %v1878_v9 }
0x100e   :  { %v425_v30 = vpop.permute.xlu0 %424 }
0x100f   :  { %v1461_v26 = vpop.eup %1460  ;;  %1324 = vmatmul.msk.f32.vlgmr.msrb.gmra.mxu1 %vm163_vm6, %v425_v30 }
0x1010   :  { %998 = vrot.lane.b32.xlu2 %v1461_v26, %s1566_s1  ;;  %728 = vmatpush.msrb.mxu1 %v1686_v51 }
0x1012   :  { %729 = vmatpush.msrb.mxu1 %v1688_v22 }
0x1014   :  { %730 = vmatpush.msrb.mxu1 %v1692_v52 }
0x1016   :  { %731 = vmatpush.msrb.mxu1 %v1696_v53  ;;  %v859_v2 = vpop.permute.xlu0 %858 }
0x1018   :  { %712 = vrot.lane.b32.xlu2 %v1820_v24, %s1567_s9 }
0x106a   :  { %v999_v5 = vpop.permute.xlu2 %998 }
0x106b   :  { %v1001_v23 = vmul.f32 %v999_v5, %v981_v8 }
0x106d   :  { %1003 = vrot.lane.b32.xlu0 %v1001_v23, %s1567_s9  ;;  %1033 = vrot.lane.b32.xlu2 %v1001_v23, %s1568_s10 }
0x1070   :  { %v961_v36 = vpop.permute.xlu1 %960 }
0x1071   :  { %v963_v40 = vmul.f32 %v961_v36, %v943_v20 }
0x1072   :  { %v713_v24 = vpop.permute.xlu2 %712 }
0x1073   :  { %1030 = vrot.lane.b32.xlu1 %v963_v40, %s1567_s9 }
0x1078   :  { %v570_v47 = vpop.permute.xlu1 %569 }
0x1079   :  { %1332 = vmatmul.msk.f32.vlgmr.msra.gmra.mxu1 %vm163_vm6, %v570_v47 }
0x107a   :  { %874 = vmatpush.msra.mxu1 %v1686_v51 }
0x107c   :  { %875 = vmatpush.msra.mxu1 %v1688_v22 }
0x107e   :  { %876 = vmatpush.msra.mxu1 %v1692_v52 }
0x1080   :  { %877 = vmatpush.msra.mxu1 %v1696_v53 }
0x1081   :  { %1340 = vmatmul.msk.f32.vlgmr.msrb.gmra.mxu1 %vm163_vm6, %v713_v24 }
0x1082   :  { %1019 = vmatpush.msrb.mxu1 %v1686_v51 }
0x1084   :  { %1020 = vmatpush.msrb.mxu1 %v1688_v22 }
0x1086   :  { %1021 = vmatpush.msrb.mxu1 %v1692_v52 }
0x1088   :  { %1022 = vmatpush.msrb.mxu1 %v1696_v53 }
0x1089   :  { %1348 = vmatmul.msk.f32.vlgmr.msra.gmra.mxu1 %vm163_vm6, %v859_v2 }
0x108a   :  { %1058 = vmatpush.bf16.msra.mxu1 %v1625_v31 }
0x108c   :  { %v445_v37 = vpop.f32.mrf.mxu1 }
0x108d   :  { %v446_v38 = vadd.f32 %v1733_v0, %v445_v37 }
0x108e   :  { %1059 = vmatpush.bf16.msra.mxu1 %v1632_v35 }
0x108f   :  { %1325 = vst.msk [vmem:[%s1983_s4 + $0x2] sm:$0x3] %vm303_vm0, %v446_v38 }
0x1092   :  { %1060 = vmatpush.bf16.msra.mxu1 %v1639_v41 }
0x1096   :  { %1061 = vmatpush.bf16.msra.mxu1 %v1647_v49 }
0x10c7   :  { %v1034_v22 = vpop.permute.xlu2 %1033 }
0x10df   :  { %v1004_v51 = vpop.permute.xlu0 %1003 }
0x10e0   :  { %1356 = vmatmul.msk.f32.vlgmr.msrb.gmra.mxu1 %vm163_vm6, %v1004_v51 }
0x10e5   :  { %v1031_v52 = vpop.permute.xlu1 %1030 }
0x10e6   :  { %v1036_v31 = vsel %vm163_vm6, %v1031_v52, %v1034_v22 }
0x10e7   :  { %v1037_v53 = vpack.c.bf16 %v1036_v31, %v1036_v31 }
0x10e9   :  { %1358 = vmatmul.msk.bf16.vlgmr.msra.gmra.mxu3 %vm166_vm7, %v1037_v53  ;;  %1359 = vmatmul.msk.bf16.vlgmr.msra.gmra.mxu1 %vm166_vm7, %v1037_v53 }
0x10f6   :  { %v590_v35 = vpop.f32.mrf.mxu1 }
0x10f7   :  { %v591_v42 = vadd.f32 %v1733_v0, %v590_v35 }
0x10f9   :  { %1333 = vst.msk [vmem:[%s1983_s4 + $0x4] sm:$0x3] %vm303_vm0, %v591_v42 }
0x10fe   :  { %v733_v41 = vpop.f32.mrf.mxu1 }
0x10ff   :  { %v734_v49 = vadd.f32 %v1733_v0, %v733_v41 }
0x1101   :  { %1341 = vst.msk [vmem:[%s1983_s4 + $0x6] sm:$0x3] %vm303_vm0, %v734_v49 }
0x1106   :  { %v879_v43 = vpop.f32.mrf.mxu1 }
0x1107   :  { %v880_v44 = vadd.f32 %v1733_v0, %v879_v43 }
0x1109   :  { %1349 = vst.msk [vmem:[%s1983_s4 + $0x8] sm:$0x3] %vm303_vm0, %v880_v44 }
0x115d   :  { %v1024_v46 = vpop.f32.mrf.mxu1 }
0x115e   :  { %v1025_v48 = vadd.f32 %v1733_v0, %v1024_v46 }
0x1160   :  { %1357 = vst.msk [vmem:[%s1983_s4 + $0xa] sm:$0x3] %vm303_vm0, %v1025_v48 }
0x1166   :  { %v1063_v50 = vpop.f32.mrf.mxu1 }
0x1167   :  { %v1070_v55 = vadd.f32 %v1936_v54, %v1063_v50 }
0x1169   :  { %v1362_v56 = vmul.f32 -1.442695, %v1070_v55 }
0x116b   :  { %1462 = vpow2.f32 %v1362_v56 }
0x116c   :  { %v1050_v59 = vpop.f32.mrf.mxu3 }
0x116d   :  { %v1069_v57 = vadd.f32 %v1067_v58, %v1050_v59 }
0x116e   :  { %v1065_v60 = vpop.f32.mrf.mxu1 }
0x116f   :  { %v1360_v61 = vmul.f32 -1.442695, %v1069_v57 }
0x1171   :  { %v1463_v1 = vpop.eup %1462  ;;  %1464 = vpow2.f32 %v1360_v61 }
0x1172   :  { %v1112_v0 = vadd.f32 1.0, %v1463_v1 }
0x1174   :  { %1466 = vrcp.f32 %v1112_v0  ;;  %v1052_v3 = vpop.f32.mrf.mxu3  ;;  %v1124_v10 = vand.u32 2147483648, %v1112_v0  ;;  %v1122_v12 = vand.u32 2147483647, %v1112_v0  ;;  %vm1118_vm3 = vweird.f32 %v1112_v0 }
0x1176   :  { %v1125_v16 = vor.u32 1.1754944e-38, %v1124_v10  ;;  %vm1123_vm5 = vcmp.eq.f32.partialorder %v1122_v12, 8.507059e+37 }
0x1177   :  { %v1465_v4 = vpop.eup %1464 }
0x1178   :  { %v1074_v6 = vadd.f32 1.0, %v1465_v4 }
0x117a   :  { %v1467_v7 = vpop.eup %1466  ;;  %1468 = vrcp.f32 %v1074_v6  ;;  %v1086_v21 = vand.u32 2147483648, %v1074_v6  ;;  %v1084_v25 = vand.u32 2147483647, %v1074_v6  ;;  %vm1080_vm9 = vweird.f32 %v1074_v6 }
0x117b   :  { %v1114_v39 = vmul.f32 %v1467_v7, %v1112_v0  ;;  %vm1119_vm2 = vweird.f32 %v1467_v7 }
0x117c   :  { %vm1120_vm4 = vmor %vm1118_vm3, %vm1119_vm2  ;;  %v1087_v29 = vor.u32 1.1754944e-38, %v1086_v21  ;;  %vm1085_vm11 = vcmp.eq.f32.partialorder %v1084_v25, 8.507059e+37 }
0x117d   :  { %v1115_v8 = vsub.f32 1.0, %v1114_v39 }
0x117f   :  { %v1116_v11 = vmul.f32 %v1467_v7, %v1115_v8 }
0x1180   :  { %v1469_v63 = vpop.eup %1468 }
0x1181   :  { %v1076_v13 = vmul.f32 %v1469_v63, %v1074_v6  ;;  %v1117_v15 = vadd.f32 %v1467_v7, %v1116_v11  ;;  %vm1081_vm8 = vweird.f32 %v1469_v63 }
0x1182   :  { %vm1082_vm10 = vmor %vm1080_vm9, %vm1081_vm8 }
0x1183   :  { %v1077_v18 = vsub.f32 1.0, %v1076_v13  ;;  %v1121_v62 = vsel %vm1120_vm4, %v1467_v7, %v1117_v15 }
0x1184   :  { %v1126_v20 = vsel %vm1123_vm5, %v1125_v16, %v1121_v62 }
0x1185   :  { %v1128_v45 = vmul.f32 2.0, %v1126_v20  ;;  %v1078_v14 = vmul.f32 %v1469_v63, %v1077_v18  ;;  %v1130_v36 = vmul.f32 %v1126_v20, %v1878_v9 }
0x1187   :  { %v1363_v27 = vadd.f32 -1.0, %v1128_v45  ;;  %v1079_v28 = vadd.f32 %v1469_v63, %v1078_v14 }
0x1189   :  { %1132 = vrot.lane.b32.xlu2 %v1363_v27, %s1566_s1  ;;  %v1083_v19 = vsel %vm1082_vm10, %v1469_v63, %v1079_v28  ;;  %v1481_v63 = vld [vmem:[#allocation5 + $0x21] ss:$0 sm:$0xff] }
0x118a   :  { %v1088_v32 = vsel %vm1085_vm11, %v1087_v29, %v1083_v19 }
0x118b   :  { %v1090_v17 = vmul.f32 2.0, %v1088_v32  ;;  %v1092_v2 = vmul.f32 %v1088_v32, %v1871_v34 }
0x118d   :  { %v1361_v33 = vadd.f32 -1.0, %v1090_v17 }
0x118f   :  { %1094 = vrot.lane.b32.xlu1 %v1361_v33, %s1566_s1 }
0x11e3   :  { %v1133_v30 = vpop.permute.xlu2 %1132 }
0x11e4   :  { %v1135_v26 = vmul.f32 %v1133_v30, %v1126_v20 }
0x11e6   :  { %1137 = vrot.lane.b32.xlu1 %v1135_v26, %s1566_s1 }
0x1201   :  { %v1095_v5 = vpop.permute.xlu1 %1094 }
0x1202   :  { %v1097_v23 = vmul.f32 %v1095_v5, %v1088_v32 }
0x1204   :  { %1099 = vrot.lane.b32.xlu0 %v1097_v23, %s1566_s1 }
0x1258   :  { %v1138_v40 = vpop.permute.xlu1 %1137 }
0x1259   :  { %v1140_v47 = vadd.f32 %v1138_v40, %v1130_v36 }
0x125b   :  { %1470 = vtanh.f32 %v1140_v47 }
0x1261   :  { %v1471_v24 = vpop.eup %1470 }
0x1262   :  { %1143 = vrot.lane.b32.xlu0 %v1471_v24, %s1566_s1 }
0x1276   :  { %v1100_v37 = vpop.permute.xlu0 %1099 }
0x1277   :  { %v1102_v38 = vadd.f32 %v1100_v37, %v1092_v2 }
0x1279   :  { %1472 = vtanh.f32 %v1102_v38 }
0x127f   :  { %v1473_v51 = vpop.eup %1472 }
0x1280   :  { %1105 = vrot.lane.b32.xlu2 %v1473_v51, %s1566_s1 }
0x12d4   :  { %v1144_v22 = vpop.permute.xlu0 %1143 }
0x12d5   :  { %v1146_v52 = vmul.f32 %v1144_v22, %v1126_v20 }
0x12d7   :  { %1178 = vrot.lane.b32.xlu2 %v1146_v52, %s1568_s10 }
0x12da   :  { %v1106_v31 = vpop.permute.xlu2 %1105 }
0x12db   :  { %v1108_v9 = vmul.f32 %v1106_v31, %v1088_v32 }
0x12dd   :  { %1175 = vrot.lane.b32.xlu1 %v1108_v9, %s1567_s9 }
0x1331   :  { %v1179_v53 = vpop.permute.xlu2 %1178 }
0x134f   :  { %v1176_v35 = vpop.permute.xlu1 %1175 }
0x1350   :  { %v1181_v42 = vsel %vm163_vm6, %v1176_v35, %v1179_v53  ;;  %1266 = vst.msk [vmem:[#allocation7] sm:$0x3] %vm1265_vm12, %v1176_v35 }
0x1351   :  { %v1182_v34 = vpack.c.bf16 %v1181_v42, %v1181_v42 }
0x1353   :  { %1366 = vmatmul.msk.bf16.vlgmr.msrb.gmra.mxu0 %vm166_vm7, %v1182_v34 }
0x13d0   :  { %v1195_v41 = vpop.f32.mrf.mxu0 }
0x13d1   :  { %v1199_v49 = vadd.f32 %v1936_v54, %v1195_v41 }
0x13d3   :  { %v1367_v43 = vmul.f32 -1.442695, %v1199_v49 }
0x13d5   :  { %1474 = vpow2.f32 %v1367_v43 }
0x13d8   :  { %v1197_v44 = vpop.f32.mrf.mxu0 }
0x13db   :  { %v1475_v46 = vpop.eup %1474 }
0x13dc   :  { %v1203_v48 = vadd.f32 1.0, %v1475_v46 }
0x13de   :  { %1476 = vrcp.f32 %v1203_v48  ;;  %v1215_v58 = vand.u32 2147483648, %v1203_v48  ;;  %v1213_v57 = vand.u32 2147483647, %v1203_v48  ;;  %vm1209_vm14 = vweird.f32 %v1203_v48 }
0x13e0   :  { %v1216_v61 = vor.u32 1.1754944e-38, %v1215_v58  ;;  %vm1214_vm7 = vcmp.eq.f32.partialorder %v1213_v57, 8.507059e+37 }
0x13e4   :  { %v1477_v50 = vpop.eup %1476 }
0x13e5   :  { %v1205_v55 = vmul.f32 %v1477_v50, %v1203_v48  ;;  %vm1210_vm13 = vweird.f32 %v1477_v50 }
0x13e6   :  { %vm1211_vm15 = vmor %vm1209_vm14, %vm1210_vm13 }
0x13e7   :  { %v1206_v56 = vsub.f32 1.0, %v1205_v55 }
0x13e9   :  { %v1207_v59 = vmul.f32 %v1477_v50, %v1206_v56 }
0x13eb   :  { %v1208_v60 = vadd.f32 %v1477_v50, %v1207_v59 }
0x13ed   :  { %v1212_v1 = vsel %vm1211_vm15, %v1477_v50, %v1208_v60 }
0x13ee   :  { %v1217_v54 = vsel %vm1214_vm7, %v1216_v61, %v1212_v1 }
0x13ef   :  { %v1219_v0 = vmul.f32 2.0, %v1217_v54  ;;  %v1221_v39 = vmul.f32 %v1217_v54, %v1140_v47 }
0x13f1   :  { %v1368_v3 = vadd.f32 -1.0, %v1219_v0 }
0x13f3   :  { %1223 = vrot.lane.b32.xlu0 %v1368_v3, %s1566_s1 }
0x13fb   :  { %1148 = vrot.lane.b32.xlu0 %v1146_v52, %s1567_s9 }
0x1465   :  { %v1224_v4 = vpop.permute.xlu0 %1223 }
0x1466   :  { %v1226_v6 = vmul.f32 %v1224_v4, %v1217_v54 }
0x1468   :  { %1228 = vrot.lane.b32.xlu1 %v1226_v6, %s1566_s1 }
0x146d   :  { %v1149_v7 = vpop.permute.xlu0 %1148 }
0x146e   :  { %1364 = vmatmul.msk.f32.vlgmr.msra.gmra.mxu2 %vm163_vm6, %v1149_v7 }
0x14da   :  { %v1229_v8 = vpop.permute.xlu1 %1228 }
0x14db   :  { %v1231_v10 = vadd.f32 %v1229_v8, %v1221_v39 }
0x14dd   :  { %1478 = vtanh.f32 %v1231_v10  ;;  %1277 = vrot.lane.b32.xlu0 %v1231_v10, %s1568_s10 }
0x14e3   :  { %v1479_v11 = vpop.eup %1478 }
0x14e4   :  { %1234 = vrot.lane.b32.xlu2 %v1479_v11, %s1566_s1 }
0x14ec   :  { %1271 = vrot.lane.b32.xlu2 %v1102_v38, %s1568_s10 }
0x14f1   :  { %v1169_v12 = vpop.f32.mrf.mxu2 }
0x14f2   :  { %v1170_v13 = vadd.f32 %v1481_v63, %v1169_v12 }
0x14f4   :  { %1365 = vst.msk [vmem:[%s1983_s4 + $0xc] sm:$0x3] %vm303_vm0, %v1170_v13 }
0x153e   :  { %v1235_v15 = vpop.permute.xlu2 %1234 }
0x153f   :  { %v1237_v16 = vmul.f32 %v1235_v15, %v1217_v54 }
0x1541   :  { %1239 = vrot.lane.b32.xlu1 %v1237_v16, %s1567_s9 }
0x1546   :  { %v1272_v18 = vpop.permute.xlu2 %1271 }
0x1547   :  { %1275 = vst.msk [vmem:[#allocation7 + $0x4] sm:$0x3] %vm1265_vm12, %v1272_v18 }
0x154f   :  { %v1278_v62 = vpop.permute.xlu0 %1277 }
0x1550   :  { %1281 = vst.msk [vmem:[#allocation7 + $0x6] sm:$0x3] %vm1265_vm12, %v1278_v62 }
0x15b3   :  { %v1240_v20 = vpop.permute.xlu1 %1239 }
0x15b4   :  { %1269 = vst.msk [vmem:[#allocation7 + $0x2] sm:$0x3] %vm1265_vm12, %v1240_v20  ;;  %1369 = vmatmul.msk.f32.vlgmr.msrb.gmra.mxu2 %vm163_vm6, %v1240_v20 }
0x15b5   :  { %1296 = dma.vmem_to_hbm [thread:$0]  %s1289_s27, 128, %s1291_s30, [#allocation4], %s1566_s1, %s1566_s1, %s1570_s6  }
0x1637   :  { %v1260_v21 = vpop.f32.mrf.mxu2 }
0x1638   :  { %v1261_v45 = vadd.f32 %v1481_v63, %v1260_v21 }
0x163a   :  { %1370 = vst.msk [vmem:[%s1983_s4 + $0xe] sm:$0x3] %vm303_vm0, %v1261_v45 }
0x163b   :  { %1558 = dma.done.wait [#allocation4], 128  }
0x163c   :  { %1559 = vsyncadd [#allocation4], 4294967168 }
0x163d   :  { %1303 = vsyncpa [#allocation3], 1 }
0x163e   :  { %1304 = vsyncpa [#allocation6], 1 }
0x163f   :  { %1305 = vsyncpa [#allocation4], 1 }

</bundles_post_ra>
